<compile_context>
chip_gen: v5e
topology: v5e:2x2
jax: 0.10.0
libtpu: 0.0.40
codegen_flags: <defaults>
</compile_context>

<pallas_src>
import jax
import jax.numpy as jnp
from jax.experimental import pallas as pl
from jax.experimental.pallas import tpu as pltpu

LN_EPS = 1e-5    # torch.nn.LayerNorm default
_LANE = 128


def _round_up(a, m):
    return ((a + m - 1) // m) * m


def _tensorcores_per_chip():
    """v7x has 2 TensorCores per chip; v5e/v6e have 1.  Used only to decide
    whether splitting the batch into >=2 grid tiles buys any parallelism."""
    try:
        kind = jax.devices()[0].device_kind.lower()
    except Exception:
        return 1
    return 2 if "v7" in kind else 1


def _choose_tiling(B, tb_max):
    """Pick (tb, padded_B, grid_len): tb a multiple of 128 lanes, as large as
    possible (overhead-bound kernel), split >=ncores ways only on multi-TC
    chips, and with final-tile padding capped."""
    Bp = _round_up(B, _LANE)
    ncores = _tensorcores_per_chip()

    # Largest lane-multiple tile up to tb_max, never larger than the batch.
    tb = max(_LANE, min(_round_up(tb_max, _LANE), Bp) // _LANE * _LANE)

    # Multi-TensorCore chips (v7x) only: keep >= ncores tiles so every TC
    # gets work; single-TC chips keep one big tile (grid is a serial loop).
    if ncores > 1 and Bp >= ncores * _LANE:
        tb = min(tb, max(_LANE, (Bp // ncores) // _LANE * _LANE))

    # Cap final-tile padding at ~12.5% of the lane-rounded batch so a large
    # tb never wastes nearly a whole tile of compute.
    while tb > _LANE and (_round_up(Bp, tb) - Bp) > (Bp // 8):
        tb -= _LANE

    Bp_full = _round_up(Bp, tb)
    return tb, Bp_full, Bp_full // tb


def _ln_relu_feat(h, gamma, beta, *, relu=True):
    """LayerNorm over the feature axis (axis 0) of a (64, tb) slab, f32,
    biased variance (matches torch.nn.LayerNorm), ReLU fused.

    One-pass statistics: mean and E[h^2] are both reduced straight from h
    (no (h-mean) slab needed for the variance); var = E[h^2] - mean^2.
    The per-column rsqrt runs on the EUP; narrow (1, tb) terms stay narrow.
    """
    mean = jnp.mean(h, axis=0, keepdims=True)          # (1, tb)
    ex2 = jnp.mean(h * h, axis=0, keepdims=True)       # (1, tb)
    var = jnp.maximum(ex2 - mean * mean, 0.0)          # guard tiny cancellation
    inv = jax.lax.rsqrt(var + LN_EPS)                  # (1, tb), EUP slot
    mc = mean * inv                                    # (1, tb), narrow
    out = gamma * (h * inv - mc) + beta                # (64, tb) slab passes
    return jnp.maximum(out, 0.0) if relu else out


def mlp_kernel(x_ref, p_ref, w2_ref, o_ref):
    x = x_ref[...]                        # (1, tb)  f32, batch on lanes
    p = p_ref[...]                        # (64, 9)  packed per-feature params
    w1, b1, g1, be1 = p[:, 0:1], p[:, 1:2], p[:, 2:3], p[:, 3:4]
    b2, g2, be2, w3 = p[:, 4:5], p[:, 5:6], p[:, 6:7], p[:, 7:8]
    b3 = p[0:1, 8:9]                      # (1, 1)  scalar bias folded into slab

    # --- layer 1: Linear(1,64) as a rank-1 broadcast multiply (VPU, no MXU) ---
    h = w1 * x + b1                                               # (64, tb)
    h = _ln_relu_feat(h, g1, be1, relu=True)

    # --- layer 2: Linear(64,64) on the MXU, f32 operands + f32 accumulate ---
    h = jnp.dot(w2_ref[...], h, preferred_element_type=jnp.float32) + b2
    h = _ln_relu_feat(h, g2, be2, relu=True)

    # --- layer 3: Linear(64,1) as a weighted feature-sum (no MXU) ---
    out = jnp.sum(h * w3, axis=0, keepdims=True) + b3             # (1, tb)
    o_ref[...] = out.astype(o_ref.dtype)


def regression_forward(x, params, *, tb_max=2048):
    """x: (B, 1) float32. params: PyTorch-shaped dict (see init_params)."""
    B, one = x.shape
    assert one == 1

    tb, Bp, n_tiles = _choose_tiling(B, tb_max)

    # --- batch-on-lanes layout + zero padding (padded lanes sliced off) ---
    xt = x.astype(jnp.float32).reshape(1, B)
    if Bp != B:
        xt = jnp.pad(xt, ((0, 0), (0, Bp - B)))

    # --- coalesce all small params (incl. b3) into one (64, 9) slab ---
    b3col = jnp.full((64,), params["b3"].reshape(()), jnp.float32)
    pslab = jnp.stack(
        [params["w1"][:, 0], params["b1"], params["g1"], params["be1"],
         params["b2"], params["g2"], params["be2"], params["w3"][0, :],
         b3col],
        axis=1).astype(jnp.float32)                       # (64, 9)
    w2 = params["w2"].astype(jnp.float32)                 # (64, 64), (out, in)

    out_t = pl.pallas_call(
        mlp_kernel,
        out_shape=jax.ShapeDtypeStruct((1, Bp), jnp.float32),
        grid_spec=pltpu.PrefetchScalarGridSpec(
            num_scalar_prefetch=0,
            grid=(n_tiles,),
            in_specs=[
                pl.BlockSpec((1, tb), lambda i: (0, i)),    # x, batch on lanes
                pl.BlockSpec((64, 9), lambda i: (0, 0)),    # packed params
                pl.BlockSpec((64, 64), lambda i: (0, 0)),   # w2 (f32)
            ],
            out_specs=pl.BlockSpec((1, tb), lambda i: (0, i)),
        ),
        compiler_params=pltpu.CompilerParams(
            dimension_semantics=("parallel",)),
    )(xt, pslab, w2)

    return out_t[:, :B].reshape(B, 1)


def init_params(key):
    """Deterministic synthetic parameters in PyTorch shapes:
    Linear weight (out, in), bias (out,); LayerNorm weight/bias (64,)."""
    k = jax.random.split(key, 8)
    return {
        "w1": jax.random.normal(k[0], (64, 1), jnp.float32) * 0.5,
        "b1": jax.random.normal(k[1], (64,), jnp.float32) * 0.1,
        "g1": 1.0 + 0.1 * jax.random.normal(k[2], (64,), jnp.float32),
        "be1": 0.1 * jax.random.normal(k[3], (64,), jnp.float32),
        "w2": jax.random.normal(k[4], (64, 64), jnp.float32) * (1.0 / 8.0),
        "b2": jax.random.normal(k[5], (64,), jnp.float32) * 0.1,
        "g2": jnp.ones((64,), jnp.float32),
        "be2": jnp.zeros((64,), jnp.float32),
        "w3": jax.random.normal(k[6], (1, 64), jnp.float32) * (1.0 / 8.0),
        "b3": jax.random.normal(k[7], (1,), jnp.float32) * 0.1,
    }


def _layernorm_last(h, gamma, beta):
    mean = jnp.mean(h, axis=-1, keepdims=True)
    var = jnp.mean(jnp.square(h - mean), axis=-1, keepdims=True)
    return (h - mean) * jax.lax.rsqrt(var + LN_EPS) * gamma + beta


def reference_forward(x, p):
    """Plain-JAX (f32) reference of the PyTorch forward for validation."""
    h = x @ p["w1"].T + p["b1"]
    h = jnp.maximum(_layernorm_last(h, p["g1"], p["be1"]), 0.0)
    h = h @ p["w2"].T + p["b2"]
    h = jnp.maximum(_layernorm_last(h, p["g2"], p["be2"]), 0.0)
    return h @ p["w3"].T + p["b3"]


if __name__ == "__main__":
    key = jax.random.PRNGKey(0)
    kx, kp = jax.random.split(key)

    B = 300                      # small batch; also exercises the lane-padding path
    x = jax.random.normal(kx, (B, 1), jnp.float32)
    params = init_params(kp)

    out = regression_forward(x, params)
    out = jax.block_until_ready(out)

    ref = reference_forward(x, params)
    assert out.shape == (B, 1)
    err = float(jnp.max(jnp.abs(out - ref)))
    # Everything (incl. the 64x64 MXU matmul) runs in f32 now.
    assert err < 1e-4, f"mismatch vs JAX reference: max abs err = {err}"

    print("KERNEL_OK")
</pallas_src>

<mosaic_0001>
module attributes {stable_mosaic.version = 11 : i64} {
  func.func @mlp_kernel(%arg0: i32, %arg1: memref<1x384xf32, #tpu.memory_space<vmem>>, %arg2: memref<64x9xf32, #tpu.memory_space<vmem>>, %arg3: memref<64x64xf32, #tpu.memory_space<vmem>>, %arg4: memref<1x384xf32, #tpu.memory_space<vmem>>) attributes {dimension_semantics = [#tpu.dimension_semantics<parallel>], iteration_bounds = array<i64: 1>, scalar_prefetch = 0 : i64, scratch_operands = 0 : i64, tpu.core_type = #tpu.core_type<tc>, window_params = [{transform_indices = @transform_0, window_bounds = array<i64: 1, 384>}, {pipeline_mode = #tpu.pipeline_mode<synchronous>, transform_indices = @transform_1, window_bounds = array<i64: 64, 9>}, {pipeline_mode = #tpu.pipeline_mode<synchronous>, transform_indices = @transform_2, window_bounds = array<i64: 64, 64>}, {transform_indices = @transform_3, window_bounds = array<i64: 1, 384>}]} {
    %c0 = arith.constant 0 : index
    %c0_0 = arith.constant 0 : index
    %0 = vector.load %arg1[%c0, %c0_0] : memref<1x384xf32, #tpu.memory_space<vmem>>, vector<1x384xf32>
    %c0_1 = arith.constant 0 : index
    %c0_2 = arith.constant 0 : index
    %1 = vector.load %arg2[%c0_1, %c0_2] : memref<64x9xf32, #tpu.memory_space<vmem>>, vector<64x9xf32>
    %2 = vector.extract_strided_slice %1 {offsets = [0, 0], sizes = [64, 1], strides = [1, 1]} : vector<64x9xf32> to vector<64x1xf32>
    %3 = vector.extract_strided_slice %1 {offsets = [0, 1], sizes = [64, 1], strides = [1, 1]} : vector<64x9xf32> to vector<64x1xf32>
    %4 = vector.extract_strided_slice %1 {offsets = [0, 2], sizes = [64, 1], strides = [1, 1]} : vector<64x9xf32> to vector<64x1xf32>
    %5 = vector.extract_strided_slice %1 {offsets = [0, 3], sizes = [64, 1], strides = [1, 1]} : vector<64x9xf32> to vector<64x1xf32>
    %6 = vector.extract_strided_slice %1 {offsets = [0, 4], sizes = [64, 1], strides = [1, 1]} : vector<64x9xf32> to vector<64x1xf32>
    %7 = vector.extract_strided_slice %1 {offsets = [0, 5], sizes = [64, 1], strides = [1, 1]} : vector<64x9xf32> to vector<64x1xf32>
    %8 = vector.extract_strided_slice %1 {offsets = [0, 6], sizes = [64, 1], strides = [1, 1]} : vector<64x9xf32> to vector<64x1xf32>
    %9 = vector.extract_strided_slice %1 {offsets = [0, 7], sizes = [64, 1], strides = [1, 1]} : vector<64x9xf32> to vector<64x1xf32>
    %10 = vector.extract_strided_slice %1 {offsets = [0, 8], sizes = [1, 1], strides = [1, 1]} : vector<64x9xf32> to vector<1x1xf32>
    %11 = vector.broadcast %2 : vector<64x1xf32> to vector<64x384xf32>
    %12 = vector.broadcast %0 : vector<1x384xf32> to vector<64x384xf32>
    %13 = arith.mulf %11, %12 : vector<64x384xf32>
    %14 = vector.broadcast %3 : vector<64x1xf32> to vector<64x384xf32>
    %15 = arith.addf %13, %14 : vector<64x384xf32>
    %cst = arith.constant dense<0.000000e+00> : vector<384xf32>
    %16 = vector.multi_reduction <add>, %15, %cst [0] : vector<64x384xf32> to vector<384xf32>
    %17 = vector.shape_cast %16 : vector<384xf32> to vector<1x384xf32>
    %cst_3 = arith.constant 6.400000e+01 : f32
    %18 = vector.broadcast %cst_3 : f32 to vector<1x384xf32>
    %19 = arith.divf %17, %18 : vector<1x384xf32>
    %20 = arith.mulf %15, %15 : vector<64x384xf32>
    %cst_4 = arith.constant dense<0.000000e+00> : vector<384xf32>
    %21 = vector.multi_reduction <add>, %20, %cst_4 [0] : vector<64x384xf32> to vector<384xf32>
    %22 = vector.shape_cast %21 : vector<384xf32> to vector<1x384xf32>
    %cst_5 = arith.constant 6.400000e+01 : f32
    %23 = vector.broadcast %cst_5 : f32 to vector<1x384xf32>
    %24 = arith.divf %22, %23 : vector<1x384xf32>
    %25 = arith.mulf %19, %19 : vector<1x384xf32>
    %26 = arith.subf %24, %25 : vector<1x384xf32>
    %cst_6 = arith.constant 0.000000e+00 : f32
    %27 = vector.broadcast %cst_6 : f32 to vector<1x384xf32>
    %28 = arith.maximumf %26, %27 : vector<1x384xf32>
    %cst_7 = arith.constant 9.99999974E-6 : f32
    %29 = vector.broadcast %cst_7 : f32 to vector<1x384xf32>
    %30 = arith.addf %28, %29 : vector<1x384xf32>
    %31 = math.rsqrt %30 : vector<1x384xf32>
    %32 = arith.mulf %19, %31 : vector<1x384xf32>
    %33 = vector.broadcast %31 : vector<1x384xf32> to vector<64x384xf32>
    %34 = arith.mulf %15, %33 : vector<64x384xf32>
    %35 = vector.broadcast %32 : vector<1x384xf32> to vector<64x384xf32>
    %36 = arith.subf %34, %35 : vector<64x384xf32>
    %37 = vector.broadcast %4 : vector<64x1xf32> to vector<64x384xf32>
    %38 = arith.mulf %37, %36 : vector<64x384xf32>
    %39 = vector.broadcast %5 : vector<64x1xf32> to vector<64x384xf32>
    %40 = arith.addf %38, %39 : vector<64x384xf32>
    %cst_8 = arith.constant 0.000000e+00 : f32
    %41 = vector.broadcast %cst_8 : f32 to vector<64x384xf32>
    %42 = arith.maximumf %40, %41 : vector<64x384xf32>
    %c0_9 = arith.constant 0 : index
    %c0_10 = arith.constant 0 : index
    %43 = vector.load %arg3[%c0_9, %c0_10] : memref<64x64xf32, #tpu.memory_space<vmem>>, vector<64x64xf32>
    %cst_11 = arith.constant dense<0.000000e+00> : vector<64x384xf32>
    %44 = tpu.matmul %43, %42, %cst_11 {dimension_numbers = #tpu.dot_dimension_numbers<[1], [0], [0], [1], [0, 0, 1, 1], [], []>} : vector<64x64xf32>, vector<64x384xf32>, vector<64x384xf32> -> vector<64x384xf32>
    %45 = vector.broadcast %6 : vector<64x1xf32> to vector<64x384xf32>
    %46 = arith.addf %44, %45 : vector<64x384xf32>
    %cst_12 = arith.constant dense<0.000000e+00> : vector<384xf32>
    %47 = vector.multi_reduction <add>, %46, %cst_12 [0] : vector<64x384xf32> to vector<384xf32>
    %48 = vector.shape_cast %47 : vector<384xf32> to vector<1x384xf32>
    %cst_13 = arith.constant 6.400000e+01 : f32
    %49 = vector.broadcast %cst_13 : f32 to vector<1x384xf32>
    %50 = arith.divf %48, %49 : vector<1x384xf32>
    %51 = arith.mulf %46, %46 : vector<64x384xf32>
    %cst_14 = arith.constant dense<0.000000e+00> : vector<384xf32>
    %52 = vector.multi_reduction <add>, %51, %cst_14 [0] : vector<64x384xf32> to vector<384xf32>
    %53 = vector.shape_cast %52 : vector<384xf32> to vector<1x384xf32>
    %cst_15 = arith.constant 6.400000e+01 : f32
    %54 = vector.broadcast %cst_15 : f32 to vector<1x384xf32>
    %55 = arith.divf %53, %54 : vector<1x384xf32>
    %56 = arith.mulf %50, %50 : vector<1x384xf32>
    %57 = arith.subf %55, %56 : vector<1x384xf32>
    %cst_16 = arith.constant 0.000000e+00 : f32
    %58 = vector.broadcast %cst_16 : f32 to vector<1x384xf32>
    %59 = arith.maximumf %57, %58 : vector<1x384xf32>
    %cst_17 = arith.constant 9.99999974E-6 : f32
    %60 = vector.broadcast %cst_17 : f32 to vector<1x384xf32>
    %61 = arith.addf %59, %60 : vector<1x384xf32>
    %62 = math.rsqrt %61 : vector<1x384xf32>
    %63 = arith.mulf %50, %62 : vector<1x384xf32>
    %64 = vector.broadcast %62 : vector<1x384xf32> to vector<64x384xf32>
    %65 = arith.mulf %46, %64 : vector<64x384xf32>
    %66 = vector.broadcast %63 : vector<1x384xf32> to vector<64x384xf32>
    %67 = arith.subf %65, %66 : vector<64x384xf32>
    %68 = vector.broadcast %7 : vector<64x1xf32> to vector<64x384xf32>
    %69 = arith.mulf %68, %67 : vector<64x384xf32>
    %70 = vector.broadcast %8 : vector<64x1xf32> to vector<64x384xf32>
    %71 = arith.addf %69, %70 : vector<64x384xf32>
    %cst_18 = arith.constant 0.000000e+00 : f32
    %72 = vector.broadcast %cst_18 : f32 to vector<64x384xf32>
    %73 = arith.maximumf %71, %72 : vector<64x384xf32>
    %74 = vector.broadcast %9 : vector<64x1xf32> to vector<64x384xf32>
    %75 = arith.mulf %73, %74 : vector<64x384xf32>
    %cst_19 = arith.constant dense<0.000000e+00> : vector<384xf32>
    %76 = vector.multi_reduction <add>, %75, %cst_19 [0] : vector<64x384xf32> to vector<384xf32>
    %77 = vector.shape_cast %76 : vector<384xf32> to vector<1x384xf32>
    %78 = vector.broadcast %10 : vector<1x1xf32> to vector<1x384xf32>
    %79 = arith.addf %77, %78 : vector<1x384xf32>
    %c0_20 = arith.constant 0 : index
    %c0_21 = arith.constant 0 : index
    %80 = vector.load %arg4[%c0_20, %c0_21] : memref<1x384xf32, #tpu.memory_space<vmem>>, vector<1x384xf32>
    tpu.vector_store %arg4[%c0_20, %c0_21], %79 {strides = array<i32>} : memref<1x384xf32, #tpu.memory_space<vmem>>, vector<1x384xf32>,
    return
  }
  func.func @transform_0(%arg0: i32) -> (i32, i32) {
    %c0_i32 = arith.constant 0 : i32
    %c0_i32_0 = arith.constant 0 : i32
    return %c0_i32, %arg0 : i32, i32
  }
  func.func @transform_1(%arg0: i32) -> (i32, i32) {
    %c0_i32 = arith.constant 0 : i32
    %c0_i32_0 = arith.constant 0 : i32
    %c0_i32_1 = arith.constant 0 : i32
    return %c0_i32, %c0_i32_0 : i32, i32
  }
  func.func @transform_2(%arg0: i32) -> (i32, i32) {
    %c0_i32 = arith.constant 0 : i32
    %c0_i32_0 = arith.constant 0 : i32
    %c0_i32_1 = arith.constant 0 : i32
    return %c0_i32, %c0_i32_0 : i32, i32
  }
  func.func @transform_3(%arg0: i32) -> (i32, i32) {
    %c0_i32 = arith.constant 0 : i32
    %c0_i32_0 = arith.constant 0 : i32
    return %c0_i32, %arg0 : i32, i32
  }
}

</mosaic_0001>

<bundles_post_ra>
// kernel: tpu_custom_call.1
= control target key start
LH: loop header
LB: loop body
LE: loop exit
PB: predicated region body
PF: predicated region fallthrough
CT: control target
= control target key end

     0   :  { %v1298_v2 = vmov 0   ;;  %s2250_s0 = inlined_call_operand.vmem [shape: f32[1,384], index: 0, kind: input, shape index: {}]   ;;  %s2251_s1 = inlined_call_operand.vmem [shape: f32[64,9], index: 1, kind: input, shape index: {}]   ;;  %s2252_s2 = inlined_call_operand.vmem [shape: f32[64,64], index: 2, kind: input, shape index: {}]   ;;  %s2253_s3 = inlined_call_operand.hbm [shape: f32[1,384], index: 3, kind: output, shape index: {}]  }
   0x1   :  { %v1332_v0 = vld [vmem:[%s2251_s1 + $0x10] sm:$0xff]  ;;  %v1337_v1 = vld [vmem:[%s2251_s1] sm:$0xff]  ;;  %1213 = vset.pattern.permute.xlu1 %v1298_v2  ;;  %1212 = vset.pattern.permute.xlu0 %v1298_v2 }
   0x2   :  { %36 = vperm.xlu1 %1213, %v1332_v0   ;;  %26 = vperm.xlu0 %1212, %v1337_v1  }
   0x3   :  { %8 = vsyncpa [#allocation3], 0  ;;  %v1344_v3 = vld [vmem:[%s2251_s1 + $0x8] sm:$0xff]  ;;  %v1299_v4 = vmov 1   ;;  %v1351_v5 = vld [vmem:[%s2251_s1 + $0x18] sm:$0xff]  ;;  %v1300_v10 = vmov 3  }
   0x4   :  { %1215 = vset.pattern.permute.xlu2 %v1299_v4  ;;  %v1358_v6 = vld [vmem:[%s2251_s1 + $0x20] sm:$0xff]  ;;  %v1366_v7 = vld [vmem:[%s2251_s1 + $0x28] sm:$0xff]  ;;  %v1371_v8 = vld [vmem:[%s2251_s1 + $0x30] sm:$0xff]  ;;  %v1301_v11 = vmov 2   ;;  %v1302_v37 = vmov 64.0   ;;  %vm535_vm10 = vcmask 523264  }
   0x5   :  { %100 = vperm.xlu2 %1215, %v1344_v3   ;;  %v1379_v9 = vld [vmem:[%s2251_s1 + $0x38] sm:$0xff]  ;;  %v15_v18 = vld [vmem:[%s2250_s0] sm:$0x7]  ;;  %1250 = vrcp.f32 %v1302_v37  ;;  %s1144_s8 = sshll.u32 %s2253_s3, 4  ;;  %s1145_s8 = int_to_ptr.hbm [resolvable:$true] %s1144_s8 }
   0x6   :  { %v1404_v20 = vperm.slane %v15_v18, 0  ;;  %v1406_v21 = vperm.slane %v15_v18, 1  ;;  %v1408_v22 = vperm.slane %v15_v18, 2 }
   0xa   :  { %1214 = vset.pattern.permute.xlu1 %v1299_v4  ;;  %31 = vperm.xlu0 %1212, %v1344_v3  }
   0xb   :  { %96 = vperm.xlu1 %1214, %v1337_v1   ;;  %v1456_v58 = vpop.eup %1250 }
   0xc   :  { %v1482_v18 = vmul.f32 64.0, %v1456_v58  ;;  %vm195_vm0 = vweird.f32 %v1456_v58 }
   0xd   :  { %1216 = vset.pattern.permute.xlu2 %v1298_v2 }
   0xe   :  { %41 = vperm.xlu2 %1216, %v1351_v5  }
  0x12   :  { %1217 = vset.pattern.permute.xlu0 %v1299_v4 }
  0x13   :  { %1218 = vset.pattern.permute.xlu1 %v1298_v2  ;;  %104 = vperm.xlu0 %1217, %v1332_v0  }
  0x14   :  { %46 = vperm.xlu1 %1218, %v1358_v6  }
  0x16   :  { %1219 = vset.pattern.permute.xlu2 %v1299_v4 }
  0x17   :  { %108 = vperm.xlu2 %1219, %v1351_v5  }
  0x1b   :  { %1220 = vset.pattern.permute.xlu0 %v1298_v2 }
  0x1c   :  { %51 = vperm.xlu1 %1218, %v1366_v7   ;;  %56 = vperm.xlu0 %1220, %v1371_v8  }
  0x1f   :  { %112 = vperm.xlu2 %1219, %v1358_v6  }
  0x24   :  { %1221 = vset.pattern.permute.xlu1 %v1299_v4  ;;  %1228 = vset.pattern.permute.xlu0 %v1300_v10 }
  0x25   :  { %116 = vperm.xlu1 %1221, %v1366_v7   ;;  %432 = vperm.xlu0 %1228, %v1358_v6  }
  0x27   :  { %1222 = vset.pattern.permute.xlu2 %v1298_v2 }
  0x28   :  { %61 = vperm.xlu2 %1222, %v1379_v9  }
  0x2d   :  { %120 = vperm.xlu1 %1221, %v1371_v8   ;;  %1229 = vset.pattern.permute.xlu0 %v1301_v11 }
  0x2e   :  { %388 = vperm.xlu0 %1229, %v1379_v9  }
  0x30   :  { %1223 = vset.pattern.permute.xlu2 %v1299_v4 }
  0x31   :  { %124 = vperm.xlu2 %1223, %v1379_v9  }
  0x35   :  { %1224 = vset.pattern.permute.xlu1 %v1301_v11 }
  0x36   :  { %384 = vperm.xlu1 %1224, %v1371_v8   ;;  %376 = vperm.xlu0 %1229, %v1358_v6  }
  0x39   :  { %1225 = vset.pattern.permute.xlu2 %v1300_v10 }
  0x3a   :  { %444 = vperm.xlu2 %1225, %v1379_v9  }
  0x3e   :  { %380 = vperm.xlu1 %1224, %v1366_v7   ;;  %360 = vperm.xlu0 %1229, %v1337_v1  }
  0x42   :  { %440 = vperm.xlu2 %1225, %v1371_v8  }
  0x46   :  { %1226 = vset.pattern.permute.xlu1 %v1300_v10 }
  0x47   :  { %436 = vperm.xlu1 %1226, %v1366_v7  }
  0x4a   :  { %1227 = vset.pattern.permute.xlu2 %v1301_v11 }
  0x4b   :  { %372 = vperm.xlu2 %1227, %v1351_v5  }
  0x4f   :  { %1230 = vset.pattern.permute.xlu1 %v1301_v11 }
  0x50   :  { %368 = vperm.xlu1 %1230, %v1332_v0  }
  0x53   :  { %1231 = vset.pattern.permute.xlu2 %v1300_v10 }
  0x54   :  { %428 = vperm.xlu2 %1231, %v1351_v5  }
  0x58   :  { %364 = vperm.xlu1 %1230, %v1344_v3  }
  0x5c   :  { %424 = vperm.xlu2 %1231, %v1332_v0  }
  0x5f   :  { %v101_v12 = vpop.permute.xlu2 %100 }
  0x60   :  { %1232 = vset.pattern.permute.xlu1 %v1300_v10 }
  0x61   :  { %420 = vperm.xlu1 %1232, %v1344_v3  }
  0x64   :  { %416 = vperm.xlu2 %1231, %v1337_v1  }
  0x68   :  { %v42_v14 = vpop.permute.xlu2 %41 }
  0x69   :  { %v80_v23 = vmul.f32 %v1404_v20, %v42_v14  ;;  %v81_v25 = vmul.f32 %v1406_v21, %v42_v14  ;;  %v82_v27 = vmul.f32 %v1408_v22, %v42_v14 }
  0x71   :  { %v109_v17 = vpop.permute.xlu2 %108 }
  0x72   :  { %v1418_v33 = vadd.f32 %v109_v17, %v80_v23  ;;  %v1421_v35 = vadd.f32 %v109_v17, %v81_v25  ;;  %v1428_v41 = vadd.f32 %v109_v17, %v82_v27 }
  0x74   :  { %v37_v13 = vpop.permute.xlu1 %36  ;;  %v27_v15 = vpop.permute.xlu0 %26  ;;  %v209_v46 = vmul.f32 %v1418_v33, %v1418_v33  ;;  %v210_v51 = vmul.f32 %v1421_v35, %v1421_v35  ;;  %v211_v56 = vmul.f32 %v1428_v41, %v1428_v41 }
  0x75   :  { %v71_v26 = vmul.f32 %v1404_v20, %v27_v15  ;;  %v72_v30 = vmul.f32 %v1406_v21, %v27_v15  ;;  %v73_v32 = vmul.f32 %v1408_v22, %v27_v15  ;;  %v77_v38 = vmul.f32 %v1404_v20, %v37_v13 }
  0x76   :  { %v78_v42 = vmul.f32 %v1406_v21, %v37_v13  ;;  %v79_v49 = vmul.f32 %v1408_v22, %v37_v13 }
  0x79   :  { %v113_v29 = vpop.permute.xlu2 %112 }
  0x7c   :  { %v32_v19 = vpop.permute.xlu0 %31 }
  0x7d   :  { %v97_v16 = vpop.permute.xlu1 %96  ;;  %v74_v28 = vmul.f32 %v1404_v20, %v32_v19  ;;  %v75_v31 = vmul.f32 %v1406_v21, %v32_v19  ;;  %v76_v34 = vmul.f32 %v1408_v22, %v32_v19 }
  0x7e   :  { %v1426_v40 = vadd.f32 %v97_v16, %v71_v26  ;;  %v1433_v44 = vadd.f32 %v97_v16, %v72_v30  ;;  %v1435_v45 = vadd.f32 %v97_v16, %v73_v32 }
  0x7f   :  { %v1424_v39 = vadd.f32 %v101_v12, %v74_v28  ;;  %v1431_v43 = vadd.f32 %v101_v12, %v75_v31  ;;  %v1442_v50 = vadd.f32 %v101_v12, %v76_v34 }
  0x80   :  { %v200_v55 = vmul.f32 %v1426_v40, %v1426_v40  ;;  %v201_v61 = vmul.f32 %v1433_v44, %v1433_v44  ;;  %v202_v63 = vmul.f32 %v1435_v45, %v1435_v45 }
  0x81   :  { %v203_v53 = vmul.f32 %v1424_v39, %v1424_v39  ;;  %v151_v54 = vadd.f32 %v1424_v39, %v1426_v40  ;;  %v204_v59 = vmul.f32 %v1431_v43, %v1431_v43  ;;  %v164_v60 = vadd.f32 %v1431_v43, %v1433_v44 }
  0x82   :  { %v62_v57 = vpop.permute.xlu2 %61  ;;  %v205_v11 = vmul.f32 %v1442_v50, %v1442_v50  ;;  %v177_v12 = vadd.f32 %v1442_v50, %v1435_v45 }
  0x83   :  { %v224_v15 = vadd.f32 %v203_v53, %v200_v55  ;;  %v237_v19 = vadd.f32 %v204_v59, %v201_v61  ;;  %v92_v25 = vmul.f32 %v1404_v20, %v62_v57  ;;  %v93_v26 = vmul.f32 %v1406_v21, %v62_v57 }
  0x84   :  { %v250_v32 = vadd.f32 %v205_v11, %v202_v63  ;;  %v192_v53 = vsub.f32 1.0, %v1482_v18 }
  0x85   :  { %v105_v36 = vpop.permute.xlu0 %104 }
  0x86   :  { %v47_v24 = vpop.permute.xlu1 %46  ;;  %v1439_v47 = vadd.f32 %v105_v36, %v77_v38  ;;  %v1446_v52 = vadd.f32 %v105_v36, %v78_v42  ;;  %v1464_v62 = vadd.f32 %v105_v36, %v79_v49  ;;  %v94_v49 = vmul.f32 %v1408_v22, %v62_v57 }
  0x87   :  { %v83_v10 = vmul.f32 %v1404_v20, %v47_v24  ;;  %v84_v14 = vmul.f32 %v1406_v21, %v47_v24  ;;  %v85_v17 = vmul.f32 %v1408_v22, %v47_v24 }
  0x88   :  { %v152_v2 = vadd.f32 %v151_v54, %v1439_v47  ;;  %v206_v4 = vmul.f32 %v1439_v47, %v1439_v47  ;;  %v165_v13 = vadd.f32 %v164_v60, %v1446_v52  ;;  %v207_v16 = vmul.f32 %v1446_v52, %v1446_v52 }
  0x89   :  { %v208_v23 = vmul.f32 %v1464_v62, %v1464_v62  ;;  %v178_v27 = vadd.f32 %v177_v12, %v1464_v62  ;;  %v1489_v30 = vadd.f32 %v113_v29, %v83_v10  ;;  %v1492_v24 = vadd.f32 %v113_v29, %v84_v14 }
  0x8a   :  { %v225_v28 = vadd.f32 %v224_v15, %v206_v4  ;;  %v153_v31 = vadd.f32 %v152_v2, %v1418_v33  ;;  %v166_v34 = vadd.f32 %v165_v13, %v1421_v35  ;;  %v238_v38 = vadd.f32 %v237_v19, %v207_v16 }
  0x8b   :  { %v1496_v42 = vadd.f32 %v113_v29, %v85_v17  ;;  %v251_v54 = vadd.f32 %v250_v32, %v208_v23  ;;  %v179_v2 = vadd.f32 %v178_v27, %v1428_v41  ;;  %v212_v29 = vmul.f32 %v1489_v30, %v1489_v30  ;;  %v125_v10 = vpop.permute.xlu2 %124 }
  0x8c   :  { %v154_v63 = vadd.f32 %v153_v31, %v1489_v30  ;;  %v226_v4 = vadd.f32 %v225_v28, %v209_v46  ;;  %v167_v57 = vadd.f32 %v166_v34, %v1492_v24  ;;  %v213_v11 = vmul.f32 %v1492_v24, %v1492_v24 }
  0x8d   :  { %v214_v13 = vmul.f32 %v1496_v42, %v1496_v42  ;;  %v239_v46 = vadd.f32 %v238_v38, %v210_v51  ;;  %v252_v17 = vadd.f32 %v251_v54, %v211_v56  ;;  %v1522_v19 = vadd.f32 %v125_v10, %v92_v25 }
  0x8e   :  { %v52_v48 = vpop.permute.xlu1 %51  ;;  %v57_v61 = vpop.permute.xlu0 %56  ;;  %v180_v23 = vadd.f32 %v179_v2, %v1496_v42  ;;  %v227_v27 = vadd.f32 %v226_v4, %v212_v29  ;;  %v1525_v28 = vadd.f32 %v125_v10, %v93_v26  ;;  %v1527_v31 = vadd.f32 %v125_v10, %v94_v49 }
  0x8f   :  { %v86_v36 = vmul.f32 %v1404_v20, %v52_v48  ;;  %v87_v55 = vmul.f32 %v1406_v21, %v52_v48  ;;  %v88_v59 = vmul.f32 %v1408_v22, %v52_v48  ;;  %v89_v14 = vmul.f32 %v1404_v20, %v57_v61 }
  0x90   :  { %v90_v15 = vmul.f32 %v1406_v21, %v57_v61  ;;  %v91_v16 = vmul.f32 %v1408_v22, %v57_v61  ;;  %v221_v49 = vmul.f32 %v1522_v19, %v1522_v19 }
  0x97   :  { %v117_v37 = vpop.permute.xlu1 %116 }
  0x98   :  { %v1502_v60 = vadd.f32 %v117_v37, %v86_v36  ;;  %v1511_v12 = vadd.f32 %v117_v37, %v87_v55  ;;  %v1513_v48 = vadd.f32 %v117_v37, %v88_v59  ;;  %v240_v36 = vadd.f32 %v239_v46, %v213_v11 }
  0x99   :  { %v253_v37 = vadd.f32 %v252_v17, %v214_v13 }
  0x9a   :  { %v215_v18 = vmul.f32 %v1502_v60, %v1502_v60  ;;  %v155_v20 = vadd.f32 %v154_v63, %v1502_v60  ;;  %v168_v21 = vadd.f32 %v167_v57, %v1511_v12  ;;  %v216_v22 = vmul.f32 %v1511_v12, %v1511_v12 }
  0x9b   :  { %v217_v51 = vmul.f32 %v1513_v48, %v1513_v48  ;;  %v181_v25 = vadd.f32 %v180_v23, %v1513_v48 }
  0x9c   :  { %v228_v38 = vadd.f32 %v227_v27, %v215_v18  ;;  %v241_v63 = vadd.f32 %v240_v36, %v216_v22 }
  0x9d   :  { %v254_v2 = vadd.f32 %v253_v37, %v217_v51 }
  0x9f   :  { %v121_v56 = vpop.permute.xlu1 %120 }
  0xa0   :  { %v1536_v32 = vadd.f32 %v121_v56, %v89_v14  ;;  %v1538_v34 = vadd.f32 %v121_v56, %v90_v15  ;;  %v1540_v26 = vadd.f32 %v121_v56, %v91_v16  ;;  %v222_v14 = vmul.f32 %v1525_v28, %v1525_v28 }
  0xa1   :  { %v223_v15 = vmul.f32 %v1527_v31, %v1527_v31 }
  0xa2   :  { %v156_v54 = vadd.f32 %v155_v20, %v1536_v32  ;;  %v169_v55 = vadd.f32 %v168_v21, %v1538_v34  ;;  %v182_v59 = vadd.f32 %v181_v25, %v1540_v26  ;;  %v218_v61 = vmul.f32 %v1536_v32, %v1536_v32 }
  0xa3   :  { %v219_v29 = vmul.f32 %v1538_v34, %v1538_v34  ;;  %v220_v4 = vmul.f32 %v1540_v26, %v1540_v26  ;;  %v193_v20 = vmul.f32 %v1456_v58, %v192_v53 }
  0xa4   :  { %v157_v10 = vadd.f32 %v156_v54, %v1522_v19  ;;  %v170_v57 = vadd.f32 %v169_v55, %v1525_v28  ;;  %v183_v11 = vadd.f32 %v182_v59, %v1527_v31  ;;  %v229_v13 = vadd.f32 %v228_v38, %v218_v61 }
  0xa5   :  { %v242_v16 = vadd.f32 %v241_v63, %v219_v29  ;;  %v255_v46 = vadd.f32 %v254_v2, %v220_v4  ;;  %v194_v63 = vadd.f32 %v1456_v58, %v193_v20 }
  0xa6   :  { %v158_v17 = vrot.slane %v157_v10, 4  ;;  %v171_v18 = vrot.slane %v170_v57, 4  ;;  %v184_v23 = vrot.slane %v183_v11, 4  ;;  %v230_v27 = vadd.f32 %v229_v13, %v221_v49 }
  0xa7   :  { %v243_v21 = vadd.f32 %v242_v16, %v222_v14  ;;  %v256_v22 = vadd.f32 %v255_v46, %v223_v15  ;;  %v1564_v46 = vsel %vm195_vm0, %v1456_v58, %v194_v63 }
  0xa8   :  { %v159_v51 = vadd.f32 %v158_v17, %v157_v10  ;;  %v172_v56 = vadd.f32 %v171_v18, %v170_v57  ;;  %v185_v25 = vadd.f32 %v184_v23, %v183_v11  ;;  %v231_v36 = vrot.slane %v230_v27, 4  ;;  %v1578_v63 = vpop.permute.xlu1 %384 }
  0xa9   :  { %v244_v37 = vrot.slane %v243_v21, 4  ;;  %v257_v38 = vrot.slane %v256_v22, 4 }
  0xaa   :  { %v160_v54 = vrot.slane %v159_v51, 2  ;;  %v173_v55 = vrot.slane %v172_v56, 2  ;;  %v186_v59 = vrot.slane %v185_v25, 2  ;;  %v232_v61 = vadd.f32 %v231_v36, %v230_v27 }
  0xab   :  { %v245_v2 = vadd.f32 %v244_v37, %v243_v21  ;;  %v258_v49 = vadd.f32 %v257_v38, %v256_v22 }
  0xac   :  { %v161_v29 = vadd.f32 %v160_v54, %v159_v51  ;;  %v174_v53 = vadd.f32 %v173_v55, %v172_v56  ;;  %v187_v4 = vadd.f32 %v186_v59, %v185_v25  ;;  %v233_v13 = vrot.slane %v232_v61, 2 }
  0xad   :  { %v246_v10 = vrot.slane %v245_v2, 2  ;;  %v259_v57 = vrot.slane %v258_v49, 2 }
  0xae   :  { %v162_v11 = vrot.slane %v161_v29, 1  ;;  %v175_v14 = vrot.slane %v174_v53, 1  ;;  %v188_v15 = vrot.slane %v187_v4, 1  ;;  %v234_v16 = vadd.f32 %v233_v13, %v232_v61 }
  0xaf   :  { %v247_v17 = vadd.f32 %v246_v10, %v245_v2  ;;  %v260_v18 = vadd.f32 %v259_v57, %v258_v49  ;;  %v1582_v10 = vpop.permute.xlu2 %444 }
  0xb0   :  { %v163_v23 = vadd.f32 %v162_v11, %v161_v29  ;;  %v176_v27 = vadd.f32 %v175_v14, %v174_v53  ;;  %v189_v20 = vadd.f32 %v188_v15, %v187_v4  ;;  %v235_v21 = vrot.slane %v234_v16, 1 }
  0xb1   :  { %v248_v22 = vrot.slane %v247_v17, 1  ;;  %v261_v51 = vrot.slane %v260_v18, 1 }
  0xb2   :  { %v197_v56 = vmul.f32 %v1564_v46, %v163_v23  ;;  %v1568_v25 = vmul.f32 %v1564_v46, %v176_v27  ;;  %v1571_v36 = vmul.f32 %v1564_v46, %v189_v20  ;;  %v236_v37 = vadd.f32 %v235_v21, %v234_v16 }
  0xb3   :  { %v249_v38 = vadd.f32 %v248_v22, %v247_v17  ;;  %v262_v58 = vadd.f32 %v261_v51, %v260_v18  ;;  %v1584_v17 = vpop.permute.xlu1 %380 }
  0xb4   :  { %v263_v54 = vmul.f32 %v236_v37, %v1564_v46  ;;  %v266_v55 = vmul.f32 %v197_v56, %v197_v56  ;;  %v267_v59 = vmul.f32 %v1568_v25, %v1568_v25  ;;  %v268_v61 = vmul.f32 %v1571_v36, %v1571_v36 }
  0xb5   :  { %v264_v2 = vmul.f32 %v249_v38, %v1564_v46  ;;  %v265_v49 = vmul.f32 %v262_v58, %v1564_v46 }
  0xb6   :  { %v269_v29 = vsub.f32 %v263_v54, %v266_v55  ;;  %v1588_v55 = vpop.permute.xlu0 %432 }
  0xb7   :  { %v270_v53 = vsub.f32 %v264_v2, %v267_v59  ;;  %v271_v4 = vsub.f32 %v265_v49, %v268_v61  ;;  %v1586_v23 = vpop.permute.xlu2 %440 }
  0xb8   :  { %v272_v13 = vmax.f32 %v269_v29, 0.0 }
  0xb9   :  { %v273_v57 = vmax.f32 %v270_v53, 0.0  ;;  %v274_v11 = vmax.f32 %v271_v4, 0.0 }
  0xba   :  { %v275_v14 = vadd.f32 1e-05, %v272_v13 }
  0xbb   :  { %v276_v15 = vadd.f32 1e-05, %v273_v57  ;;  %v277_v16 = vadd.f32 1e-05, %v274_v11  ;;  %v1590_v61 = vpop.permute.xlu1 %436 }
  0xbc   :  { %1252 = vrsqrt.f32 %v275_v14  ;;  %vm284_vm3 = vweird.f32 %v275_v14 }
  0xbd   :  { %1254 = vrsqrt.f32 %v276_v15  ;;  %vm294_vm6 = vweird.f32 %v276_v15  ;;  %vm304_vm8 = vweird.f32 %v277_v16 }
  0xbe   :  { %1256 = vrsqrt.f32 %v277_v16 }
  0xbf   :  { %v373_v57 = vpop.permute.xlu2 %372 }
  0xc2   :  { %v1253_v18 = vpop.eup %1252 }
  0xc3   :  { %v1255_v27 = vpop.eup %1254  ;;  %v279_v20 = vmul.f32 %v1253_v18, %v275_v14  ;;  %vm285_vm1 = vweird.f32 %v1253_v18 }
  0xc4   :  { %v1257_v21 = vpop.eup %1256  ;;  %v289_v22 = vmul.f32 %v1255_v27, %v276_v15  ;;  %vm295_vm2 = vweird.f32 %v1255_v27  ;;  %vm286_vm5 = vmor %vm284_vm3, %vm285_vm1 }
  0xc5   :  { %v280_v51 = vmul.f32 %v1253_v18, %v279_v20  ;;  %v299_v37 = vmul.f32 %v1257_v21, %v277_v16  ;;  %vm305_vm4 = vweird.f32 %v1257_v21  ;;  %vm296_vm7 = vmor %vm294_vm6, %vm295_vm2 }
  0xc6   :  { %v290_v38 = vmul.f32 %v1255_v27, %v289_v22  ;;  %vm306_vm9 = vmor %vm304_vm8, %vm305_vm4  ;;  %vm1127_vm4 = vcmask 1040384  }
  0xc7   :  { %v281_v58 = vmul.f32 0.5, %v280_v51  ;;  %v300_v54 = vmul.f32 %v1257_v21, %v299_v37 }
  0xc8   :  { %v291_v59 = vmul.f32 0.5, %v290_v38 }
  0xc9   :  { %v282_v2 = vsub.f32 1.5, %v281_v58  ;;  %v301_v49 = vmul.f32 0.5, %v300_v54  ;;  %v369_v54 = vpop.permute.xlu1 %368 }
  0xca   :  { %v292_v29 = vsub.f32 1.5, %v291_v59 }
  0xcb   :  { %v283_v53 = vmul.f32 %v1253_v18, %v282_v2  ;;  %v302_v4 = vsub.f32 1.5, %v301_v49 }
  0xcc   :  { %v293_v13 = vmul.f32 %v1255_v27, %v292_v29 }
  0xcd   :  { %v1592_v11 = vsel %vm286_vm5, %v1253_v18, %v283_v53  ;;  %v303_v20 = vmul.f32 %v1257_v21, %v302_v4  ;;  %vm1129_vm5 = vcmask 1041408  }
  0xce   :  { %v1594_v22 = vsel %vm296_vm7, %v1255_v27, %v293_v13  ;;  %v1597_v51 = vmul.f32 %v1592_v11, %v197_v56  ;;  %v329_v14 = vmul.f32 %v1592_v11, %v1536_v32  ;;  %v326_v37 = vmul.f32 %v1592_v11, %v1502_v60 }
  0xcf   :  { %v1603_v38 = vsel %vm306_vm9, %v1257_v21, %v303_v20  ;;  %v1607_v15 = vmul.f32 %v1594_v22, %v1568_v25  ;;  %v330_v16 = vmul.f32 %v1594_v22, %v1538_v34  ;;  %v327_v18 = vmul.f32 %v1594_v22, %v1511_v12  ;;  %v389_v12 = vpop.permute.xlu0 %388 }
  0xd0   :  { %v1615_v56 = vmul.f32 %v1603_v38, %v1571_v36  ;;  %v331_v32 = vmul.f32 %v1603_v38, %v1540_v26  ;;  %v353_v60 = vsub.f32 %v329_v14, %v1597_v51  ;;  %v328_v27 = vmul.f32 %v1603_v38, %v1513_v48 }
  0xd1   :  { %v354_v25 = vsub.f32 %v330_v16, %v1607_v15  ;;  %v350_v21 = vsub.f32 %v326_v37, %v1597_v51  ;;  %v320_v34 = vmul.f32 %v1592_v11, %v1418_v33  ;;  %v351_v36 = vsub.f32 %v327_v18, %v1607_v15  ;;  %v1653_v37 = vpop.permute.xlu2 %428 }
  0xd2   :  { %v355_v58 = vsub.f32 %v331_v32, %v1615_v56  ;;  %v321_v26 = vmul.f32 %v1594_v22, %v1421_v35  ;;  %v409_v59 = vmul.f32 %v1578_v63, %v353_v60  ;;  %v352_v48 = vsub.f32 %v328_v27, %v1615_v56 }
  0xd3   :  { %v322_v2 = vmul.f32 %v1603_v38, %v1428_v41  ;;  %v1635_v49 = vmul.f32 %v1578_v63, %v354_v25  ;;  %v1638_v33 = vmul.f32 %v1584_v17, %v350_v21  ;;  %v344_v29 = vsub.f32 %v320_v34, %v1597_v51 }
  0xd4   :  { %v345_v53 = vsub.f32 %v321_v26, %v1607_v15  ;;  %v332_v4 = vmul.f32 %v1592_v11, %v1522_v19  ;;  %v333_v13 = vmul.f32 %v1594_v22, %v1525_v28  ;;  %v334_v41 = vmul.f32 %v1603_v38, %v1527_v31 }
  0xd5   :  { %v346_v35 = vsub.f32 %v322_v2, %v1615_v56  ;;  %v411_v20 = vmul.f32 %v1578_v63, %v355_v58  ;;  %v1651_v14 = vmul.f32 %v1584_v17, %v351_v36  ;;  %v317_v16 = vmul.f32 %v1592_v11, %v1439_v47 }
  0xd6   :  { %v318_v18 = vmul.f32 %v1594_v22, %v1446_v52  ;;  %v408_v19 = vmul.f32 %v1584_v17, %v352_v48  ;;  %v1660_v32 = vmul.f32 %v373_v57, %v344_v29  ;;  %v356_v28 = vsub.f32 %v332_v4, %v1597_v51 }
  0xd7   :  { %v357_v31 = vsub.f32 %v333_v13, %v1607_v15  ;;  %v1664_v63 = vmul.f32 %v373_v57, %v345_v53  ;;  %v358_v60 = vsub.f32 %v334_v41, %v1615_v56  ;;  %v319_v27 = vmul.f32 %v1603_v38, %v1464_v62  ;;  %v377_v62 = vpop.permute.xlu0 %376  ;;  %v365_v53 = vpop.permute.xlu1 %364 }
  0xd8   :  { %v323_v47 = vmul.f32 %v1592_v11, %v1489_v30  ;;  %v1671_v25 = vmul.f32 %v373_v57, %v346_v35  ;;  %v341_v52 = vsub.f32 %v317_v16, %v1597_v51  ;;  %v342_v17 = vsub.f32 %v318_v18, %v1607_v15 }
  0xd9   :  { %v324_v21 = vmul.f32 %v1594_v22, %v1492_v24  ;;  %v412_v34 = vmul.f32 %v389_v12, %v356_v28  ;;  %v413_v58 = vmul.f32 %v389_v12, %v357_v31  ;;  %v343_v36 = vsub.f32 %v319_v27, %v1615_v56 }
  0xda   :  { %v325_v26 = vmul.f32 %v1603_v38, %v1496_v42  ;;  %v347_v48 = vsub.f32 %v323_v47, %v1597_v51  ;;  %v314_v57 = vmul.f32 %v1592_v11, %v1424_v39  ;;  %v315_v2 = vmul.f32 %v1594_v22, %v1431_v43 }
  0xdb   :  { %v348_v30 = vsub.f32 %v324_v21, %v1607_v15  ;;  %v414_v29 = vmul.f32 %v389_v12, %v358_v60  ;;  %v316_v35 = vmul.f32 %v1603_v38, %v1442_v50  ;;  %v311_v42 = vmul.f32 %v1592_v11, %v1426_v40  ;;  %v425_v11 = vpop.permute.xlu2 %424 }
  0xdc   :  { %v349_v24 = vsub.f32 %v325_v26, %v1615_v56  ;;  %v397_v4 = vmul.f32 %v369_v54, %v341_v52  ;;  %v398_v13 = vmul.f32 %v369_v54, %v342_v17  ;;  %v338_v41 = vsub.f32 %v314_v57, %v1597_v51 }
  0xdd   :  { %v339_v16 = vsub.f32 %v315_v2, %v1607_v15  ;;  %v399_v39 = vmul.f32 %v369_v54, %v343_v36  ;;  %v340_v18 = vsub.f32 %v316_v35, %v1615_v56  ;;  %v312_v43 = vmul.f32 %v1594_v22, %v1433_v44 }
  0xde   :  { %v313_v12 = vmul.f32 %v1603_v38, %v1435_v45  ;;  %v403_v28 = vmul.f32 %v377_v62, %v347_v48  ;;  %v404_v50 = vmul.f32 %v377_v62, %v348_v30  ;;  %v405_v31 = vmul.f32 %v377_v62, %v349_v24 }
  0xdf   :  { %v468_v40 = vadd.f32 %v1582_v10, %v412_v34  ;;  %v394_v60 = vmul.f32 %v365_v53, %v338_v41  ;;  %v395_v27 = vmul.f32 %v365_v53, %v339_v16  ;;  %v335_v47 = vsub.f32 %v311_v42, %v1597_v51  ;;  %v361_v26 = vpop.permute.xlu0 %360 }
  0xe0   :  { %v1701_v54 = vadd.f32 %v1582_v10, %v413_v58  ;;  %v396_v52 = vmul.f32 %v365_v53, %v340_v18  ;;  %v1704_v44 = vadd.f32 %v1582_v10, %v414_v29  ;;  %v465_v45 = vadd.f32 %v1586_v23, %v409_v59 }
  0xe1   :  { %v492_v17 = vmax.f32 %v468_v40, 0.0  ;;  %v336_v22 = vsub.f32 %v312_v43, %v1607_v15  ;;  %v337_v38 = vsub.f32 %v313_v12, %v1615_v56  ;;  %v1712_v34 = vadd.f32 %v1586_v23, %v1635_v49 }
  0xe2   :  { %v493_v21 = vmax.f32 %v1701_v54, 0.0  ;;  %v494_v51 = vmax.f32 %v1704_v44, 0.0  ;;  %v489_v58 = vmax.f32 %v465_v45, 0.0  ;;  %v1716_v10 = vadd.f32 %v1586_v23, %v411_v20  ;;  %v1792_v45 = vld [vmem:[%s2252_s2 + $0x30] sm:$0xff]  ;;  %v502_v54 = vld [vmem:[%s2252_s2 + $0x38] sm:$0xff] }
  0xe3   :  { %568 = vmatpush.msra.mxu0 %v492_v17  ;;  %1177 = vmatpush.msra.mxu3 %v492_v17  ;;  %v462_v59 = vadd.f32 %v1590_v61, %v1638_v33  ;;  %v490_v15 = vmax.f32 %v1712_v34, 0.0  ;;  %v1725_v56 = vadd.f32 %v1590_v61, %v1651_v14  ;;  %v1728_v49 = vadd.f32 %v1590_v61, %v408_v19  ;;  %v421_v61 = vpop.permute.xlu1 %420  ;;  %v1268_v34 = vld [vmem:[%s2251_s1 + $0x10] sm:$0xff] }
  0xe4   :  { %609 = vmatpush.msra.mxu1 %v493_v21  ;;  %v459_v36 = vadd.f32 %v1588_v55, %v403_v28  ;;  %650 = vmatpush.msra.mxu2 %v494_v51  ;;  %v491_v23 = vmax.f32 %v1716_v10, 0.0  ;;  %v1735_v20 = vadd.f32 %v1588_v55, %v404_v50  ;;  %v1738_v62 = vadd.f32 %v1588_v55, %v405_v31 }
  0xe5   :  { %569 = vmatpush.msra.mxu0 %v489_v58  ;;  %v486_v33 = vmax.f32 %v462_v59, 0.0  ;;  %v391_v14 = vmul.f32 %v361_v26, %v335_v47  ;;  %v392_v48 = vmul.f32 %v361_v26, %v336_v22  ;;  %1178 = vmatpush.msra.mxu3 %v489_v58  ;;  %v487_v19 = vmax.f32 %v1725_v56, 0.0  ;;  %v1270_v58 = vld [vmem:[%s2251_s1 + $0x30] sm:$0xff]  ;;  %v1271_v59 = vld [vmem:[%s2251_s1 + $0x38] sm:$0xff] }
  0xe6   :  { %610 = vmatpush.msra.mxu1 %v490_v15  ;;  %v456_v30 = vadd.f32 %v1653_v37, %v1660_v32  ;;  %651 = vmatpush.msra.mxu2 %v491_v23  ;;  %v488_v57 = vmax.f32 %v1728_v49, 0.0  ;;  %v483_v55 = vmax.f32 %v459_v36, 0.0  ;;  %v1750_v2 = vadd.f32 %v1653_v37, %v1664_v63 }
  0xe7   :  { %570 = vmatpush.msra.mxu0 %v486_v33  ;;  %v1754_v29 = vadd.f32 %v1653_v37, %v1671_v25  ;;  %v393_v24 = vmul.f32 %v361_v26, %v337_v38  ;;  %1179 = vmatpush.msra.mxu3 %v486_v33  ;;  %v484_v32 = vmax.f32 %v1735_v20, 0.0  ;;  %v453_v53 = vadd.f32 %v425_v11, %v397_v4  ;;  %v417_v25 = vpop.permute.xlu2 %416  ;;  %v496_v38 = vld [vmem:[%s2252_s2 + $0x8] sm:$0xff] }
  0xe8   :  { %611 = vmatpush.msra.mxu1 %v487_v19  ;;  %v1759_v35 = vadd.f32 %v425_v11, %v398_v13  ;;  %652 = vmatpush.msra.mxu2 %v488_v57  ;;  %v485_v63 = vmax.f32 %v1738_v62, 0.0  ;;  %v480_v42 = vmax.f32 %v456_v30, 0.0  ;;  %v1764_v41 = vadd.f32 %v425_v11, %v399_v39 }
  0xe9   :  { %571 = vmatpush.msra.mxu0 %v483_v55  ;;  %v450_v37 = vadd.f32 %v421_v61, %v394_v60  ;;  %1180 = vmatpush.msra.mxu3 %v483_v55  ;;  %v481_v16 = vmax.f32 %v1750_v2, 0.0  ;;  %v451_v4 = vadd.f32 %v421_v61, %v395_v27  ;;  %v482_v13 = vmax.f32 %v1754_v29, 0.0 }
  0xea   :  { %612 = vmatpush.msra.mxu1 %v484_v32  ;;  %653 = vmatpush.msra.mxu2 %v485_v63  ;;  %v477_v18 = vmax.f32 %v453_v53, 0.0  ;;  %v1772_v43 = vadd.f32 %v421_v61, %v396_v52  ;;  %v447_v39 = vadd.f32 %v417_v25, %v391_v14  ;;  %v478_v12 = vmax.f32 %v1759_v35, 0.0  ;;  %v495_v52 = vld [vmem:[%s2252_s2] sm:$0xff] }
  0xeb   :  { %572 = vmatpush.msra.mxu0 %v480_v42  ;;  %1181 = vmatpush.msra.mxu3 %v480_v42  ;;  %v448_v28 = vadd.f32 %v417_v25, %v392_v48  ;;  %v479_v50 = vmax.f32 %v1764_v41, 0.0  ;;  %v474_v31 = vmax.f32 %v450_v37, 0.0  ;;  %v1778_v40 = vadd.f32 %v417_v25, %v393_v24 }
  0xec   :  { %613 = vmatpush.msra.mxu1 %v481_v16  ;;  %654 = vmatpush.msra.mxu2 %v482_v13  ;;  %v475_v11 = vmax.f32 %v451_v4, 0.0  ;;  %v476_v60 = vmax.f32 %v1772_v43, 0.0  ;;  %v471_v27 = vmax.f32 %v447_v39, 0.0  ;;  %v1303_v22 = vmov 4  }
  0xed   :  { %573 = vmatpush.msra.mxu0 %v477_v18  ;;  %1182 = vmatpush.msra.mxu3 %v477_v18  ;;  %v472_v47 = vmax.f32 %v448_v28, 0.0  ;;  %v473_v17 = vmax.f32 %v1778_v40, 0.0  ;;  %v1305_v44 = vmov 6   ;;  %v1306_v10 = vmov 7  }
  0xee   :  { %614 = vmatpush.msra.mxu1 %v478_v12  ;;  %655 = vmatpush.msra.mxu2 %v479_v50  ;;  %v1307_v26 = vmov 8  }
  0xef   :  { %574 = vmatpush.msra.mxu0 %v474_v31  ;;  %1183 = vmatpush.msra.mxu3 %v474_v31 }
  0xf0   :  { %615 = vmatpush.msra.mxu1 %v475_v11  ;;  %656 = vmatpush.msra.mxu2 %v476_v60 }
  0xf1   :  { %575 = vmatpush.msra.mxu0 %v471_v27  ;;  %1184 = vmatpush.msra.mxu3 %v471_v27 }
  0xf2   :  { %616 = vmatpush.msra.mxu1 %v472_v47  ;;  %657 = vmatpush.msra.mxu2 %v473_v17 }
  0xf3   :  { %1153 = vmatmul.msk.f32.vlgmr.msra.gmra.mxu0 %vm535_vm10, %v495_v52  ;;  %1159 = vmatmul.msk.f32.vlgmr.msra.gmra.mxu3 %vm535_vm10, %v1792_v45 }
  0xf4   :  { %1161 = vmatmul.msk.f32.vlgmr.msra.gmra.mxu1 %vm535_vm10, %v495_v52  ;;  %1185 = vmatpush.msrb.mxu3 %v493_v21  ;;  %v1267_v21 = vld [vmem:[%s2251_s1 + $0x20] sm:$0xff] }
  0xf5   :  { %1169 = vmatmul.msk.f32.vlgmr.msra.gmra.mxu2 %vm535_vm10, %v495_v52  ;;  %1233 = vset.pattern.permute.xlu1 %v1303_v22 }
  0xf6   :  { %1235 = vset.pattern.permute.xlu0 %v1303_v22  ;;  %1186 = vmatpush.msrb.mxu3 %v490_v15 }
  0xf7   :  { %504 = vperm.xlu1 %1233, %v1337_v1   ;;  %512 = vperm.xlu0 %1235, %v1332_v0   ;;  %v497_v1 = vld [vmem:[%s2252_s2 + $0x10] sm:$0xff] }
  0xf8   :  { %1234 = vset.pattern.permute.xlu2 %v1303_v22  ;;  %1187 = vmatpush.msrb.mxu3 %v487_v19 }
  0xf9   :  { %508 = vperm.xlu2 %1234, %v1344_v3   ;;  %v498_v3 = vld [vmem:[%s2252_s2 + $0x18] sm:$0xff] }
  0xfa   :  { %1188 = vmatpush.msrb.mxu3 %v484_v32 }
  0xfb   :  { %1154 = vmatmul.msk.f32.gmra.mxu0 %vm535_vm10, %v496_v38  ;;  %1160 = vmatmul.msk.f32.gmra.mxu3 %vm535_vm10, %v502_v54 }
  0xfc   :  { %1162 = vmatmul.msk.f32.gmra.mxu1 %vm535_vm10, %v496_v38  ;;  %1189 = vmatpush.msrb.mxu3 %v481_v16 }
  0xfd   :  { %1170 = vmatmul.msk.f32.gmra.mxu2 %vm535_vm10, %v496_v38 }
  0xfe   :  { %1190 = vmatpush.msrb.mxu3 %v478_v12 }
  0xff   :  { %516 = vperm.xlu1 %1233, %v1351_v5   ;;  %532 = vperm.xlu0 %1235, %v1379_v9   ;;  %v1304_v5 = vmov 5  }
 0x100   :  { %1191 = vmatpush.msrb.mxu3 %v475_v11 }
 0x101   :  { %520 = vperm.xlu2 %1234, %v1358_v6   ;;  %v1264_v6 = vld [vmem:[%s2251_s1] sm:$0xff] }
 0x102   :  { %1192 = vmatpush.msrb.mxu3 %v472_v47 }
 0x103   :  { %1155 = vmatmul.msk.f32.gmra.mxu0 %vm535_vm10, %v497_v1  ;;  %1167 = vmatmul.msk.f32.vlgmr.msrb.gmra.mxu3 %vm535_vm10, %v1792_v45 }
 0x104   :  { %1193 = vmatpush.msra.mxu3 %v494_v51  ;;  %1163 = vmatmul.msk.f32.gmra.mxu1 %vm535_vm10, %v497_v1  ;;  %v1269_v51 = vld [vmem:[%s2251_s1 + $0x28] sm:$0xff] }
 0x105   :  { %1171 = vmatmul.msk.f32.gmra.mxu2 %vm535_vm10, %v497_v1 }
 0x106   :  { %1194 = vmatpush.msra.mxu3 %v491_v23 }
 0x107   :  { %524 = vperm.xlu1 %1233, %v1366_v7   ;;  %1238 = vset.pattern.permute.xlu0 %v1304_v5  ;;  %v1265_v7 = vld [vmem:[%s2251_s1 + $0x8] sm:$0xff] }
 0x108   :  { %1195 = vmatpush.msra.mxu3 %v488_v57  ;;  %893 = vperm.xlu0 %1238, %v1332_v0   ;;  %v499_v0 = vld [vmem:[%s2252_s2 + $0x20] sm:$0xff] }
 0x109   :  { %528 = vperm.xlu2 %1234, %v1371_v8   ;;  %v500_v8 = vld [vmem:[%s2252_s2 + $0x28] sm:$0xff] }
 0x10a   :  { %1196 = vmatpush.msra.mxu3 %v485_v63 }
 0x10b   :  { %1156 = vmatmul.msk.f32.gmra.mxu0 %vm535_vm10, %v498_v3  ;;  %1168 = vmatmul.msk.f32.gmra.mxu3 %vm535_vm10, %v502_v54 }
 0x10c   :  { %1197 = vmatpush.msra.mxu3 %v482_v13  ;;  %1164 = vmatmul.msk.f32.gmra.mxu1 %vm535_vm10, %v498_v3 }
 0x10d   :  { %1172 = vmatmul.msk.f32.gmra.mxu2 %vm535_vm10, %v498_v3 }
 0x10e   :  { %1198 = vmatpush.msra.mxu3 %v479_v50 }
 0x10f   :  { %1236 = vset.pattern.permute.xlu1 %v1304_v5 }
 0x110   :  { %1199 = vmatpush.msra.mxu3 %v476_v60  ;;  %885 = vperm.xlu1 %1236, %v1264_v6  }
 0x111   :  { %1237 = vset.pattern.permute.xlu2 %v1304_v5  ;;  %913 = vperm.xlu0 %1238, %v1379_v9   ;;  %v1266_v9 = vld [vmem:[%s2251_s1 + $0x18] sm:$0xff]  ;;  %s1308_s1 = smov [#allocation2]  }
 0x112   :  { %1200 = vmatpush.msra.mxu3 %v473_v17  ;;  %889 = vperm.xlu2 %1237, %v1265_v7   ;;  %s1142_s5 = sshll.u32 %s1308_s1, 4  ;;  %s1143_s5 = int_to_ptr.vmem [resolvable:$true] %s1142_s5 }
 0x113   :  { %1157 = vmatmul.msk.f32.gmra.mxu0 %vm535_vm10, %v499_v0  ;;  %1175 = vmatmul.msk.f32.vlgmr.msra.gmra.mxu3 %vm535_vm10, %v1792_v45 }
 0x114   :  { %1165 = vmatmul.msk.f32.gmra.mxu1 %vm535_vm10, %v499_v0 }
 0x115   :  { %1173 = vmatmul.msk.f32.gmra.mxu2 %vm535_vm10, %v499_v0 }
 0x118   :  { %897 = vperm.xlu1 %1236, %v1266_v9  }
 0x119   :  { %1241 = vset.pattern.permute.xlu0 %v1305_v44 }
 0x11a   :  { %901 = vperm.xlu2 %1237, %v1267_v21   ;;  %949 = vperm.xlu0 %1241, %v1268_v34  }
 0x11b   :  { %1158 = vmatmul.msk.f32.gmra.mxu0 %vm535_vm10, %v500_v8  ;;  %1176 = vmatmul.msk.f32.gmra.mxu3 %vm535_vm10, %v502_v54 }
 0x11c   :  { %1166 = vmatmul.msk.f32.gmra.mxu1 %vm535_vm10, %v500_v8 }
 0x11d   :  { %1174 = vmatmul.msk.f32.gmra.mxu2 %vm535_vm10, %v500_v8 }
 0x120   :  { %905 = vperm.xlu1 %1236, %v1269_v51  }
 0x122   :  { %909 = vperm.xlu2 %1237, %v1270_v58   ;;  %1244 = vset.pattern.permute.xlu0 %v1306_v10 }
 0x123   :  { %1029 = vperm.xlu0 %1244, %v1268_v34  }
 0x128   :  { %1239 = vset.pattern.permute.xlu1 %v1305_v44 }
 0x129   :  { %941 = vperm.xlu1 %1239, %v1264_v6  }
 0x12a   :  { %1240 = vset.pattern.permute.xlu2 %v1305_v44 }
 0x12b   :  { %945 = vperm.xlu2 %1240, %v1265_v7   ;;  %1246 = vset.pattern.permute.xlu0 %v1305_v44 }
 0x12c   :  { %969 = vperm.xlu0 %1246, %v1271_v59  }
 0x131   :  { %953 = vperm.xlu1 %1239, %v1266_v9  }
 0x133   :  { %957 = vperm.xlu2 %1240, %v1267_v21  }
 0x134   :  { %1249 = vset.pattern.permute.xlu0 %v1307_v26 }
 0x139   :  { %1242 = vset.pattern.permute.xlu1 %v1306_v10 }
 0x13a   :  { %1021 = vperm.xlu1 %1242, %v1264_v6  }
 0x13b   :  { %1243 = vset.pattern.permute.xlu2 %v1306_v10 }
 0x13c   :  { %1025 = vperm.xlu2 %1243, %v1265_v7  }
 0x142   :  { %1245 = vset.pattern.permute.xlu1 %v1305_v44 }
 0x143   :  { %961 = vperm.xlu1 %1245, %v1269_v51  }
 0x144   :  { %1033 = vperm.xlu2 %1243, %v1266_v9  }
 0x14b   :  { %965 = vperm.xlu1 %1245, %v1270_v58  }
 0x14c   :  { %1037 = vperm.xlu2 %1243, %v1267_v21  }
 0x153   :  { %1247 = vset.pattern.permute.xlu1 %v1306_v10  ;;  %v509_v49 = vpop.permute.xlu2 %508 }
 0x154   :  { %1041 = vperm.xlu1 %1247, %v1269_v51   ;;  %1045 = vperm.xlu2 %1243, %v1270_v58  }
 0x15b   :  { %v1895_v19 = vpop.permute.xlu2 %520 }
 0x15c   :  { %1049 = vperm.xlu1 %1247, %v1271_v59   ;;  %1248 = vset.pattern.permute.xlu2 %v1307_v26 }
 0x15d   :  { %1116 = vperm.xlu2 %1248, %v1264_v6  }
 0x163   :  { %v1897_v53 = vpop.permute.xlu2 %528 }
 0x169   :  { %v505_v20 = vpop.permute.xlu1 %504  ;;  %v513_v55 = vpop.permute.xlu0 %512 }
 0x170   :  { %v577_v15 = vpop.f32.mrf.mxu0 }
 0x171   :  { %v618_v56 = vpop.f32.mrf.mxu1  ;;  %v517_v57 = vpop.permute.xlu1 %516  ;;  %v1899_v35 = vadd.f32 %v577_v15, %v505_v20 }
 0x172   :  { %v1907_v37 = vadd.f32 %v618_v56, %v505_v20  ;;  %v1916_v13 = vpop.permute.xlu0 %532 }
 0x173   :  { %v725_v18 = vmul.f32 %v1899_v35, %v1899_v35 }
 0x174   :  { %v726_v27 = vmul.f32 %v1907_v37, %v1907_v37 }
 0x176   :  { %v595_v36 = vpop.f32.mrf.mxu3 }
 0x177   :  { %v1910_v25 = vadd.f32 %v595_v36, %v1897_v53 }
 0x178   :  { %v659_v23 = vpop.f32.mrf.mxu2  ;;  %v580_v33 = vpop.f32.mrf.mxu0 }
 0x179   :  { %v621_v62 = vpop.f32.mrf.mxu1  ;;  %v1901_v63 = vadd.f32 %v580_v33, %v509_v49  ;;  %v1905_v41 = vpop.permute.xlu1 %524  ;;  %v1920_v43 = vadd.f32 %v659_v23, %v505_v20  ;;  %v743_v47 = vmul.f32 %v1910_v25, %v1910_v25 }
 0x17a   :  { %v1903_v42 = vadd.f32 %v621_v62, %v509_v49 }
 0x17b   :  { %v728_v39 = vmul.f32 %v1901_v63, %v1901_v63  ;;  %v727_v1 = vmul.f32 %v1920_v43, %v1920_v43  ;;  %v683_v3 = vadd.f32 %v1901_v63, %v1899_v35 }
 0x17c   :  { %v729_v50 = vmul.f32 %v1903_v42, %v1903_v42  ;;  %v696_v0 = vadd.f32 %v1903_v42, %v1907_v37 }
 0x17d   :  { %v749_v5 = vadd.f32 %v728_v39, %v725_v18 }
 0x17e   :  { %v598_v14 = vpop.f32.mrf.mxu3  ;;  %v762_v6 = vadd.f32 %v729_v50, %v726_v27 }
 0x17f   :  { %v1937_v17 = vadd.f32 %v598_v14, %v1916_v13 }
 0x180   :  { %v662_v48 = vpop.f32.mrf.mxu2  ;;  %v583_v61 = vpop.f32.mrf.mxu0 }
 0x181   :  { %v624_v30 = vpop.f32.mrf.mxu1  ;;  %v1912_v16 = vadd.f32 %v583_v61, %v513_v55  ;;  %v1934_v52 = vadd.f32 %v662_v48, %v509_v49  ;;  %v746_v51 = vmul.f32 %v1937_v17, %v1937_v17 }
 0x182   :  { %v1914_v4 = vadd.f32 %v624_v30, %v513_v55  ;;  %v1967_v59 = vpop.permute.xlu1 %885 }
 0x183   :  { %v731_v45 = vmul.f32 %v1912_v16, %v1912_v16  ;;  %v709_v44 = vadd.f32 %v1934_v52, %v1920_v43  ;;  %v684_v21 = vadd.f32 %v683_v3, %v1912_v16  ;;  %v730_v49 = vmul.f32 %v1934_v52, %v1934_v52  ;;  %v2007_v3 = vpop.permute.xlu2 %889 }
 0x184   :  { %v732_v22 = vmul.f32 %v1914_v4, %v1914_v4  ;;  %v697_v34 = vadd.f32 %v696_v0, %v1914_v4 }
 0x185   :  { %v750_v58 = vadd.f32 %v749_v5, %v731_v45  ;;  %v775_v45 = vadd.f32 %v730_v49, %v727_v1 }
 0x186   :  { %v636_v2 = vpop.f32.mrf.mxu3  ;;  %v763_v10 = vadd.f32 %v762_v6, %v732_v22 }
 0x187   :  { %v1976_v36 = vadd.f32 %v636_v2, %v1897_v53 }
 0x188   :  { %v665_v29 = vpop.f32.mrf.mxu2  ;;  %v586_v24 = vpop.f32.mrf.mxu0 }
 0x189   :  { %v627_v32 = vpop.f32.mrf.mxu1  ;;  %v1926_v31 = vadd.f32 %v586_v24, %v517_v57  ;;  %v1955_v7 = vadd.f32 %v665_v29, %v513_v55 }
 0x18a   :  { %v1928_v40 = vadd.f32 %v627_v32, %v517_v57 }
 0x18b   :  { %v734_v8 = vmul.f32 %v1926_v31, %v1926_v31  ;;  %v685_v26 = vadd.f32 %v684_v21, %v1926_v31  ;;  %v733_v62 = vmul.f32 %v1955_v7, %v1955_v7  ;;  %v710_v22 = vadd.f32 %v709_v44, %v1955_v7 }
 0x18c   :  { %v735_v9 = vmul.f32 %v1928_v40, %v1928_v40  ;;  %v698_v23 = vadd.f32 %v697_v34, %v1928_v40 }
 0x18d   :  { %v751_v14 = vadd.f32 %v750_v58, %v734_v8 }
 0x18e   :  { %v639_v12 = vpop.f32.mrf.mxu3  ;;  %v764_v48 = vadd.f32 %v763_v10, %v735_v9  ;;  %v776_v9 = vadd.f32 %v775_v45, %v733_v62 }
 0x18f   :  { %v1993_v18 = vadd.f32 %v639_v12, %v1916_v13  ;;  %v744_v12 = vmul.f32 %v1976_v36, %v1976_v36 }
 0x190   :  { %v668_v28 = vpop.f32.mrf.mxu2  ;;  %v589_v11 = vpop.f32.mrf.mxu0 }
 0x191   :  { %v630_v60 = vpop.f32.mrf.mxu1  ;;  %v1944_v38 = vadd.f32 %v589_v11, %v1895_v19  ;;  %v1982_v61 = vadd.f32 %v668_v28, %v517_v57  ;;  %v747_v1 = vmul.f32 %v1993_v18, %v1993_v18 }
 0x192   :  { %v1947_v54 = vadd.f32 %v630_v60, %v1895_v19 }
 0x193   :  { %v737_v15 = vmul.f32 %v1944_v38, %v1944_v38  ;;  %v686_v29 = vadd.f32 %v685_v26, %v1944_v38  ;;  %v711_v21 = vadd.f32 %v710_v22, %v1982_v61 }
 0x194   :  { %v738_v56 = vmul.f32 %v1947_v54, %v1947_v54  ;;  %v699_v2 = vadd.f32 %v698_v23, %v1947_v54 }
 0x195   :  { %v752_v39 = vadd.f32 %v751_v14, %v737_v15 }
 0x196   :  { %v677_v20 = vpop.f32.mrf.mxu3  ;;  %v765_v50 = vadd.f32 %v764_v48, %v738_v56 }
 0x198   :  { %v671_v33 = vpop.f32.mrf.mxu2  ;;  %v592_v30 = vpop.f32.mrf.mxu0 }
 0x199   :  { %v633_v55 = vpop.f32.mrf.mxu1  ;;  %v1987_v24 = vadd.f32 %v592_v30, %v1905_v41  ;;  %v1996_v57 = vadd.f32 %v671_v33, %v1895_v19  ;;  %v736_v19 = vmul.f32 %v1982_v61, %v1982_v61  ;;  %v2022_v33 = vadd.f32 %v677_v20, %v1897_v53 }
 0x19a   :  { %v1990_v32 = vadd.f32 %v633_v55, %v1905_v41 }
 0x19b   :  { %v687_v28 = vadd.f32 %v686_v29, %v1987_v24  ;;  %v740_v11 = vmul.f32 %v1987_v24, %v1987_v24  ;;  %v739_v44 = vmul.f32 %v1996_v57, %v1996_v57  ;;  %v777_v26 = vadd.f32 %v776_v9, %v736_v19  ;;  %v2027_v29 = vpop.permute.xlu1 %897  ;;  %v2038_v19 = vpop.permute.xlu2 %901 }
 0x19c   :  { %v700_v60 = vadd.f32 %v699_v2, %v1990_v32  ;;  %v741_v27 = vmul.f32 %v1990_v32, %v1990_v32  ;;  %v712_v23 = vadd.f32 %v711_v21, %v1996_v57 }
 0x19d   :  { %v688_v5 = vadd.f32 %v687_v28, %v1910_v25  ;;  %v753_v0 = vadd.f32 %v752_v39, %v740_v11 }
 0x19e   :  { %v701_v6 = vadd.f32 %v700_v60, %v1976_v36  ;;  %v766_v8 = vadd.f32 %v765_v50, %v741_v27  ;;  %v680_v49 = vpop.f32.mrf.mxu3 }
 0x19f   :  { %v689_v34 = vadd.f32 %v688_v5, %v1937_v17  ;;  %v754_v58 = vadd.f32 %v753_v0, %v743_v47  ;;  %v778_v47 = vadd.f32 %v777_v26, %v739_v44  ;;  %v2033_v50 = vadd.f32 %v680_v49, %v1916_v13 }
 0x1a0   :  { %v702_v10 = vadd.f32 %v701_v6, %v1993_v18  ;;  %v767_v15 = vadd.f32 %v766_v8, %v744_v12  ;;  %v674_v56 = vpop.f32.mrf.mxu2 }
 0x1a1   :  { %v2025_v62 = vadd.f32 %v674_v56, %v1905_v41  ;;  %v690_v14 = vrot.slane %v689_v34, 4  ;;  %v755_v48 = vadd.f32 %v754_v58, %v746_v51  ;;  %v745_v51 = vmul.f32 %v2022_v33, %v2022_v33 }
 0x1a2   :  { %v703_v30 = vrot.slane %v702_v10, 4  ;;  %v768_v55 = vadd.f32 %v767_v15, %v747_v1  ;;  %v748_v13 = vmul.f32 %v2033_v50, %v2033_v50 }
 0x1a3   :  { %v713_v2 = vadd.f32 %v712_v23, %v2025_v62  ;;  %v742_v39 = vmul.f32 %v2025_v62, %v2025_v62  ;;  %v691_v53 = vadd.f32 %v690_v14, %v689_v34  ;;  %v756_v20 = vrot.slane %v755_v48, 4 }
 0x1a4   :  { %v704_v28 = vadd.f32 %v703_v30, %v702_v10  ;;  %v769_v41 = vrot.slane %v768_v55, 4  ;;  %v2043_v30 = vpop.permute.xlu1 %905 }
 0x1a5   :  { %v779_v11 = vadd.f32 %v778_v47, %v742_v39  ;;  %v714_v60 = vadd.f32 %v713_v2, %v2022_v33  ;;  %v692_v27 = vrot.slane %v691_v53, 2  ;;  %v757_v45 = vadd.f32 %v756_v20, %v755_v48 }
 0x1a6   :  { %v705_v12 = vrot.slane %v704_v28, 2  ;;  %v770_v22 = vadd.f32 %v769_v41, %v768_v55 }
 0x1a7   :  { %v715_v5 = vadd.f32 %v714_v60, %v2033_v50  ;;  %v780_v0 = vadd.f32 %v779_v11, %v745_v51  ;;  %v693_v6 = vadd.f32 %v692_v27, %v691_v53  ;;  %v758_v8 = vrot.slane %v757_v45, 2 }
 0x1a8   :  { %v706_v9 = vadd.f32 %v705_v12, %v704_v28  ;;  %v771_v1 = vrot.slane %v770_v22, 2 }
 0x1a9   :  { %v716_v21 = vrot.slane %v715_v5, 4  ;;  %v781_v44 = vadd.f32 %v780_v0, %v748_v13  ;;  %v694_v34 = vrot.slane %v693_v6, 1  ;;  %v759_v58 = vadd.f32 %v758_v8, %v757_v45  ;;  %v2049_v45 = vpop.permute.xlu2 %909 }
 0x1aa   :  { %v707_v10 = vrot.slane %v706_v9, 1  ;;  %v772_v15 = vadd.f32 %v771_v1, %v770_v22 }
 0x1ab   :  { %v717_v56 = vadd.f32 %v716_v21, %v715_v5  ;;  %v782_v49 = vrot.slane %v781_v44, 4  ;;  %v695_v26 = vadd.f32 %v694_v34, %v693_v6  ;;  %v760_v23 = vrot.slane %v759_v58, 1 }
 0x1ac   :  { %v708_v14 = vadd.f32 %v707_v10, %v706_v9  ;;  %v773_v48 = vrot.slane %v772_v15, 1 }
 0x1ad   :  { %v718_v55 = vrot.slane %v717_v56, 2  ;;  %v783_v47 = vadd.f32 %v782_v49, %v781_v44  ;;  %v722_v2 = vmul.f32 %v695_v26, %v1564_v46  ;;  %v761_v39 = vadd.f32 %v760_v23, %v759_v58  ;;  %v2054_v44 = vpop.permute.xlu1 %941 }
 0x1ae   :  { %v723_v53 = vmul.f32 %v708_v14, %v1564_v46  ;;  %v774_v20 = vadd.f32 %v773_v48, %v772_v15 }
 0x1af   :  { %v719_v28 = vadd.f32 %v718_v55, %v717_v56  ;;  %v784_v41 = vrot.slane %v783_v47, 2  ;;  %v788_v51 = vmul.f32 %v761_v39, %v1564_v46  ;;  %v791_v11 = vmul.f32 %v722_v2, %v722_v2 }
 0x1b0   :  { %v789_v60 = vmul.f32 %v774_v20, %v1564_v46  ;;  %v792_v27 = vmul.f32 %v723_v53, %v723_v53 }
 0x1b1   :  { %v720_v12 = vrot.slane %v719_v28, 1  ;;  %v785_v22 = vadd.f32 %v784_v41, %v783_v47  ;;  %v794_v5 = vsub.f32 %v788_v51, %v791_v11  ;;  %v2059_v26 = vpop.permute.xlu2 %945  ;;  %v2063_v51 = vpop.permute.xlu0 %893 }
 0x1b2   :  { %v795_v13 = vsub.f32 %v789_v60, %v792_v27 }
 0x1b3   :  { %v721_v0 = vadd.f32 %v720_v12, %v719_v28  ;;  %v786_v6 = vrot.slane %v785_v22, 1  ;;  %v797_v8 = vmax.f32 %v794_v5, 0.0 }
 0x1b4   :  { %v798_v9 = vmax.f32 %v795_v13, 0.0 }
 0x1b5   :  { %v2052_v1 = vmul.f32 %v721_v0, %v1564_v46  ;;  %v787_v21 = vadd.f32 %v786_v6, %v785_v22  ;;  %v800_v34 = vadd.f32 1e-05, %v797_v8  ;;  %v2061_v47 = vpop.permute.xlu1 %953 }
 0x1b6   :  { %v801_v58 = vadd.f32 1e-05, %v798_v9 }
 0x1b7   :  { %v790_v10 = vmul.f32 %v787_v21, %v1564_v46  ;;  %v793_v15 = vmul.f32 %v2052_v1, %v2052_v1  ;;  %1258 = vrsqrt.f32 %v800_v34  ;;  %vm809_vm13 = vweird.f32 %v800_v34 }
 0x1b8   :  { %1260 = vrsqrt.f32 %v801_v58  ;;  %vm819_vm15 = vweird.f32 %v801_v58 }
 0x1b9   :  { %v796_v56 = vsub.f32 %v790_v10, %v793_v15  ;;  %v2065_v27 = vpop.permute.xlu2 %957 }
 0x1bb   :  { %v799_v49 = vmax.f32 %v796_v56, 0.0 }
 0x1bd   :  { %v802_v23 = vadd.f32 1e-05, %v799_v49  ;;  %v1259_v14 = vpop.eup %1258  ;;  %v2069_v8 = vpop.permute.xlu1 %1021 }
 0x1be   :  { %v1261_v48 = vpop.eup %1260  ;;  %v804_v55 = vmul.f32 %v1259_v14, %v800_v34  ;;  %vm810_vm11 = vweird.f32 %v1259_v14 }
 0x1bf   :  { %1262 = vrsqrt.f32 %v802_v23  ;;  %v814_v39 = vmul.f32 %v1261_v48, %v801_v58  ;;  %vm820_vm12 = vweird.f32 %v1261_v48  ;;  %vm811_vm14 = vmor %vm809_vm13, %vm810_vm11  ;;  %vm829_vm1 = vweird.f32 %v802_v23 }
 0x1c0   :  { %v805_v20 = vmul.f32 %v1259_v14, %v804_v55  ;;  %vm821_vm0 = vmor %vm819_vm15, %vm820_vm12 }
 0x1c1   :  { %v815_v28 = vmul.f32 %v1261_v48, %v814_v39  ;;  %v2105_v39 = vpop.permute.xlu0 %913 }
 0x1c2   :  { %v806_v46 = vmul.f32 0.5, %v805_v20 }
 0x1c3   :  { %v816_v41 = vmul.f32 0.5, %v815_v28 }
 0x1c4   :  { %v807_v60 = vsub.f32 1.5, %v806_v46  ;;  %v2112_v46 = vpop.permute.xlu2 %1025 }
 0x1c5   :  { %v1263_v11 = vpop.eup %1262  ;;  %v817_v12 = vsub.f32 1.5, %v816_v41 }
 0x1c6   :  { %v824_v22 = vmul.f32 %v1263_v11, %v802_v23  ;;  %v808_v5 = vmul.f32 %v1259_v14, %v807_v60  ;;  %vm830_vm2 = vweird.f32 %v1263_v11 }
 0x1c7   :  { %v818_v13 = vmul.f32 %v1261_v48, %v817_v12  ;;  %vm831_vm3 = vmor %vm829_vm1, %vm830_vm2 }
 0x1c8   :  { %v825_v0 = vmul.f32 %v1263_v11, %v824_v22  ;;  %v2067_v6 = vsel %vm811_vm14, %v1259_v14, %v808_v5 }
 0x1c9   :  { %v2072_v9 = vmul.f32 %v2067_v6, %v722_v2  ;;  %v2076_v21 = vmul.f32 %v2067_v6, %v1987_v24  ;;  %v2078_v10 = vsel %vm821_vm0, %v1261_v48, %v818_v13  ;;  %v854_v34 = vmul.f32 %v2067_v6, %v1910_v25 }
 0x1ca   :  { %v2083_v58 = vmul.f32 %v2078_v10, %v723_v53  ;;  %v2087_v15 = vmul.f32 %v2078_v10, %v1990_v32  ;;  %v855_v2 = vmul.f32 %v2078_v10, %v1976_v36  ;;  %v826_v56 = vmul.f32 0.5, %v825_v0 }
 0x1cb   :  { %v839_v24 = vmul.f32 %v2067_v6, %v1901_v63  ;;  %v840_v49 = vmul.f32 %v2078_v10, %v1903_v42  ;;  %v878_v25 = vsub.f32 %v854_v34, %v2072_v9  ;;  %v836_v32 = vmul.f32 %v2067_v6, %v1899_v35 }
 0x1cc   :  { %v879_v53 = vsub.f32 %v855_v2, %v2083_v58  ;;  %v827_v14 = vsub.f32 1.5, %v826_v56  ;;  %v875_v36 = vsub.f32 %v2076_v21, %v2072_v9  ;;  %v837_v63 = vmul.f32 %v2078_v10, %v1907_v37 }
 0x1cd   :  { %v863_v48 = vsub.f32 %v839_v24, %v2072_v9  ;;  %v864_v55 = vsub.f32 %v840_v49, %v2083_v58  ;;  %v876_v42 = vsub.f32 %v2087_v15, %v2083_v58  ;;  %v860_v28 = vsub.f32 %v836_v32, %v2072_v9  ;;  %v2144_v49 = vpop.permute.xlu1 %961 }
 0x1ce   :  { %v828_v20 = vmul.f32 %v1263_v11, %v827_v14  ;;  %v848_v35 = vmul.f32 %v2067_v6, %v1944_v38  ;;  %v861_v60 = vsub.f32 %v837_v63, %v2083_v58  ;;  %v849_v12 = vmul.f32 %v2078_v10, %v1947_v54 }
 0x1cf   :  { %v919_v41 = vmul.f32 %v2007_v3, %v863_v48  ;;  %v920_v37 = vmul.f32 %v2007_v3, %v864_v55  ;;  %v2122_v22 = vmul.f32 %v2049_v45, %v878_v25  ;;  %v2125_v5 = vmul.f32 %v2049_v45, %v879_v53 }
 0x1d0   :  { %v2127_v38 = vsel %vm831_vm3, %v1263_v11, %v828_v20  ;;  %v916_v23 = vmul.f32 %v1967_v59, %v860_v28  ;;  %v872_v54 = vsub.f32 %v848_v35, %v2072_v9  ;;  %v917_v11 = vmul.f32 %v1967_v59, %v861_v60 }
 0x1d1   :  { %v2132_v13 = vmul.f32 %v2127_v38, %v2052_v1  ;;  %v841_v0 = vmul.f32 %v2127_v38, %v1934_v52  ;;  %v975_v34 = vadd.f32 %v2059_v26, %v919_v41  ;;  %v976_v2 = vadd.f32 %v2059_v26, %v920_v37 }
 0x1d2   :  { %v838_v56 = vmul.f32 %v2127_v38, %v1920_v43  ;;  %v845_v24 = vmul.f32 %v2067_v6, %v1926_v31  ;;  %v2148_v1 = vmul.f32 %v2127_v38, %v2033_v50  ;;  %v850_v25 = vmul.f32 %v2127_v38, %v1996_v57 }
 0x1d3   :  { %v865_v52 = vsub.f32 %v841_v0, %v2132_v13  ;;  %v873_v53 = vsub.f32 %v849_v12, %v2083_v58  ;;  %v999_v14 = vmax.f32 %v975_v34, 0.0  ;;  %v972_v32 = vadd.f32 %v2054_v44, %v916_v23  ;;  %v950_v12 = vpop.permute.xlu0 %949 }
 0x1d4   :  { %v862_v43 = vsub.f32 %v838_v56, %v2132_v13  ;;  %v973_v31 = vadd.f32 %v2054_v44, %v917_v11  ;;  %v874_v55 = vsub.f32 %v850_v25, %v2132_v13  ;;  %v928_v50 = vmul.f32 %v2038_v19, %v872_v54 }
 0x1d5   :  { %v921_v48 = vmul.f32 %v2007_v3, %v865_v52  ;;  %v929_v63 = vmul.f32 %v2038_v19, %v873_v53  ;;  %v1000_v20 = vmax.f32 %v976_v2, 0.0  ;;  %v846_v28 = vmul.f32 %v2078_v10, %v1928_v40 }
 0x1d6   :  { %v918_v57 = vmul.f32 %v1967_v59, %v862_v43  ;;  %v847_v35 = vmul.f32 %v2127_v38, %v1982_v61  ;;  %v930_v37 = vmul.f32 %v2038_v19, %v874_v55  ;;  %v2169_v3 = vadd.f32 %v2065_v27, %v928_v50  ;;  %v1034_v61 = vpop.permute.xlu2 %1033 }
 0x1d7   :  { %v977_v41 = vadd.f32 %v2059_v26, %v921_v48  ;;  %v2172_v60 = vadd.f32 %v2065_v27, %v929_v63  ;;  %v869_v59 = vsub.f32 %v845_v24, %v2072_v9  ;;  %v870_v40 = vsub.f32 %v846_v28, %v2083_v58  ;;  %v2195_v48 = vpop.permute.xlu1 %965 }
 0x1d8   :  { %v974_v23 = vadd.f32 %v2054_v44, %v918_v57  ;;  %v871_v0 = vsub.f32 %v847_v35, %v2132_v13  ;;  %v996_v26 = vmax.f32 %v972_v32, 0.0  ;;  %v997_v54 = vmax.f32 %v973_v31, 0.0 }
 0x1d9   :  { %v1001_v34 = vmax.f32 %v977_v41, 0.0  ;;  %v2179_v19 = vadd.f32 %v2065_v27, %v930_v37  ;;  %v1008_v2 = vmax.f32 %v2169_v3, 0.0  ;;  %v925_v56 = vmul.f32 %v2027_v29, %v869_v59 }
 0x1da   :  { %v926_v11 = vmul.f32 %v2027_v29, %v870_v40  ;;  %v927_v44 = vmul.f32 %v2027_v29, %v871_v0  ;;  %v1009_v24 = vmax.f32 %v2172_v60, 0.0  ;;  %v842_v52 = vmul.f32 %v2067_v6, %v1912_v16 }
 0x1db   :  { %v843_v25 = vmul.f32 %v2078_v10, %v1914_v4  ;;  %v844_v27 = vmul.f32 %v2127_v38, %v1955_v7  ;;  %v998_v53 = vmax.f32 %v974_v23, 0.0  ;;  %v981_v43 = vadd.f32 %v2061_v47, %v925_v56  ;;  %v1030_v0 = vpop.permute.xlu0 %1029 }
 0x1dc   :  { %v982_v32 = vadd.f32 %v2061_v47, %v926_v11  ;;  %v983_v31 = vadd.f32 %v2061_v47, %v927_v44  ;;  %v866_v29 = vsub.f32 %v842_v52, %v2072_v9  ;;  %v1055_v4 = vmul.f32 %v2112_v46, %v999_v14 }
 0x1dd   :  { %v867_v55 = vsub.f32 %v843_v25, %v2083_v58  ;;  %v868_v16 = vsub.f32 %v844_v27, %v2132_v13  ;;  %v1010_v50 = vmax.f32 %v2179_v19, 0.0  ;;  %v1005_v7 = vmax.f32 %v981_v43, 0.0 }
 0x1de   :  { %v1006_v63 = vmax.f32 %v982_v32, 0.0  ;;  %v1056_v57 = vmul.f32 %v2112_v46, %v1000_v20  ;;  %v1007_v28 = vmax.f32 %v983_v31, 0.0  ;;  %v922_v35 = vmul.f32 %v2063_v51, %v866_v29  ;;  %v1038_v19 = vpop.permute.xlu2 %1037 }
 0x1df   :  { %v1057_v47 = vmul.f32 %v2112_v46, %v1001_v34  ;;  %v1052_v41 = vmul.f32 %v2069_v8, %v996_v26  ;;  %v1053_v37 = vmul.f32 %v2069_v8, %v997_v54  ;;  %v1054_v3 = vmul.f32 %v2069_v8, %v998_v53 }
 0x1e0   :  { %v857_v14 = vmul.f32 %v2067_v6, %v1937_v17  ;;  %v858_v23 = vmul.f32 %v2078_v10, %v1993_v18  ;;  %v923_v59 = vmul.f32 %v2063_v51, %v867_v55  ;;  %v924_v20 = vmul.f32 %v2063_v51, %v868_v16 }
 0x1e1   :  { %v1076_v40 = vadd.f32 %v1055_v4, %v1052_v41  ;;  %v883_v46 = vsub.f32 %v2148_v1, %v2132_v13  ;;  %v1061_v8 = vmul.f32 %v1034_v61, %v1005_v7  ;;  %v1062_v54 = vmul.f32 %v1034_v61, %v1006_v63 }
 0x1e2   :  { %v881_v34 = vsub.f32 %v857_v14, %v2072_v9  ;;  %v882_v26 = vsub.f32 %v858_v23, %v2083_v58  ;;  %v1089_v17 = vadd.f32 %v1056_v57, %v1053_v37  ;;  %v1102_v6 = vadd.f32 %v1057_v47, %v1054_v3 }
 0x1e3   :  { %v853_v18 = vmul.f32 %v2127_v38, %v2025_v62  ;;  %v931_v51 = vmul.f32 %v2043_v30, %v875_v36  ;;  %v939_v10 = vmul.f32 %v2105_v39, %v883_v46  ;;  %v1063_v1 = vmul.f32 %v1034_v61, %v1007_v28  ;;  %v1042_v61 = vpop.permute.xlu1 %1041  ;;  %v970_v28 = vpop.permute.xlu0 %969 }
 0x1e4   :  { %v932_v56 = vmul.f32 %v2043_v30, %v876_v42  ;;  %v978_v11 = vadd.f32 %v950_v12, %v922_v35  ;;  %v979_v25 = vadd.f32 %v950_v12, %v923_v59  ;;  %v980_v62 = vadd.f32 %v950_v12, %v924_v20 }
 0x1e5   :  { %v877_v44 = vsub.f32 %v853_v18, %v2132_v13  ;;  %v987_v52 = vadd.f32 %v2144_v49, %v931_v51  ;;  %v937_v27 = vmul.f32 %v2105_v39, %v881_v34  ;;  %v938_v9 = vmul.f32 %v2105_v39, %v882_v26 }
 0x1e6   :  { %v988_v21 = vadd.f32 %v2144_v49, %v932_v56  ;;  %v1002_v36 = vmax.f32 %v978_v11, 0.0  ;;  %v1003_v58 = vmax.f32 %v979_v25, 0.0  ;;  %v1004_v15 = vmax.f32 %v980_v62, 0.0  ;;  %v1046_v47 = vpop.permute.xlu2 %1045 }
 0x1e7   :  { %v933_v53 = vmul.f32 %v2043_v30, %v877_v44  ;;  %v1064_v42 = vmul.f32 %v1038_v19, %v1008_v2  ;;  %v1011_v43 = vmax.f32 %v987_v52, 0.0  ;;  %v856_v31 = vmul.f32 %v2127_v38, %v2022_v33 }
 0x1e8   :  { %v1012_v32 = vmax.f32 %v988_v21, 0.0  ;;  %v990_v12 = vadd.f32 %v2195_v48, %v2122_v22  ;;  %v991_v39 = vadd.f32 %v2195_v48, %v2125_v5  ;;  %v1058_v55 = vmul.f32 %v1030_v0, %v1002_v36 }
 0x1e9   :  { %v989_v29 = vadd.f32 %v2144_v49, %v933_v53  ;;  %v1059_v16 = vmul.f32 %v1030_v0, %v1003_v58  ;;  %v1065_v30 = vmul.f32 %v1038_v19, %v1009_v24  ;;  %v880_v2 = vsub.f32 %v856_v31, %v2132_v13 }
 0x1ea   :  { %v1014_v4 = vmax.f32 %v990_v12, 0.0  ;;  %v1060_v7 = vmul.f32 %v1030_v0, %v1004_v15  ;;  %v1066_v57 = vmul.f32 %v1038_v19, %v1010_v50  ;;  %v1077_v33 = vadd.f32 %v1076_v40, %v1058_v55 }
 0x1eb   :  { %v1013_v63 = vmax.f32 %v989_v29, 0.0  ;;  %v1090_v38 = vadd.f32 %v1089_v17, %v1059_v16  ;;  %v936_v22 = vmul.f32 %v2049_v45, %v880_v2  ;;  %v1015_v49 = vmax.f32 %v991_v39, 0.0  ;;  %v1050_v26 = vpop.permute.xlu1 %1049 }
 0x1ec   :  { %v1103_v35 = vadd.f32 %v1102_v6, %v1060_v7  ;;  %v1067_v5 = vmul.f32 %v1042_v61, %v1011_v43  ;;  %v1078_v41 = vadd.f32 %v1077_v33, %v1061_v8  ;;  %v1070_v3 = vmul.f32 %v1046_v47, %v1014_v4 }
 0x1ed   :  { %v1091_v37 = vadd.f32 %v1090_v38, %v1062_v54  ;;  %v1068_v60 = vmul.f32 %v1042_v61, %v1012_v32  ;;  %v992_v24 = vadd.f32 %v2195_v48, %v936_v22  ;;  %v993_v14 = vadd.f32 %v970_v28, %v937_v27 }
 0x1ee   :  { %v1104_v13 = vadd.f32 %v1103_v35, %v1063_v1  ;;  %v994_v23 = vadd.f32 %v970_v28, %v938_v9  ;;  %v1069_v59 = vmul.f32 %v1042_v61, %v1013_v63  ;;  %v1079_v50 = vadd.f32 %v1078_v41, %v1064_v42  ;;  %v1117_v29 = vpop.permute.xlu2 %1116 }
 0x1ef   :  { %v1092_v20 = vadd.f32 %v1091_v37, %v1065_v30  ;;  %v995_v40 = vadd.f32 %v970_v28, %v939_v10  ;;  %v1016_v46 = vmax.f32 %v992_v24, 0.0  ;;  %v1017_v45 = vmax.f32 %v993_v14, 0.0 }
 0x1f0   :  { %v1105_v0 = vadd.f32 %v1104_v13, %v1066_v57  ;;  %v1018_v34 = vmax.f32 %v994_v23, 0.0  ;;  %v1071_v19 = vmul.f32 %v1046_v47, %v1015_v49  ;;  %v1080_v17 = vadd.f32 %v1079_v50, %v1067_v5 }
 0x1f1   :  { %v1093_v8 = vadd.f32 %v1092_v20, %v1068_v60  ;;  %v1019_v54 = vmax.f32 %v995_v40, 0.0  ;;  %v1072_v6 = vmul.f32 %v1046_v47, %v1016_v46  ;;  %v1073_v51 = vmul.f32 %v1050_v26, %v1017_v45 }
 0x1f2   :  { %v1106_v18 = vadd.f32 %v1105_v0, %v1069_v59  ;;  %v1074_v48 = vmul.f32 %v1050_v26, %v1018_v34  ;;  %v1081_v1 = vadd.f32 %v1080_v17, %v1070_v3  ;;  %v1132_v2 = vlaneseq }
 0x1f3   :  { %v1094_v56 = vadd.f32 %v1093_v8, %v1071_v19  ;;  %v1075_v11 = vmul.f32 %v1050_v26, %v1019_v54 }
 0x1f4   :  { %v1107_v44 = vadd.f32 %v1106_v18, %v1072_v6  ;;  %v1082_v52 = vadd.f32 %v1081_v1, %v1073_v51  ;;  %vm1134_vm6 = vcmp.lt.s32.totalorder %v1132_v2, 384 }
 0x1f5   :  { %v1095_v25 = vadd.f32 %v1094_v56, %v1074_v48 }
 0x1f6   :  { %v1108_v10 = vadd.f32 %v1107_v44, %v1075_v11  ;;  %v1083_v62 = vrot.slane %v1082_v52, 4 }
 0x1f7   :  { %v1096_v27 = vrot.slane %v1095_v25, 4 }
 0x1f8   :  { %v1109_v9 = vrot.slane %v1108_v10, 4  ;;  %v1084_v21 = vadd.f32 %v1083_v62, %v1082_v52 }
 0x1f9   :  { %v1097_v36 = vadd.f32 %v1096_v27, %v1095_v25 }
 0x1fa   :  { %v1110_v61 = vadd.f32 %v1109_v9, %v1108_v10  ;;  %v1085_v53 = vrot.slane %v1084_v21, 2 }
 0x1fb   :  { %v1098_v58 = vrot.slane %v1097_v36, 2 }
 0x1fc   :  { %v1111_v15 = vrot.slane %v1110_v61, 2  ;;  %v1086_v42 = vadd.f32 %v1085_v53, %v1084_v21 }
 0x1fd   :  { %v1099_v43 = vadd.f32 %v1098_v58, %v1097_v36 }
 0x1fe   :  { %v1112_v32 = vadd.f32 %v1111_v15, %v1110_v61  ;;  %v1087_v31 = vrot.slane %v1086_v42, 1 }
 0x1ff   :  { %v1100_v12 = vrot.slane %v1099_v43, 1 }
 0x200   :  { %v1113_v39 = vrot.slane %v1112_v32, 1  ;;  %v1088_v55 = vadd.f32 %v1087_v31, %v1086_v42 }
 0x201   :  { %v1101_v16 = vadd.f32 %v1100_v12, %v1099_v43 }
 0x202   :  { %v1114_v30 = vadd.f32 %v1113_v39, %v1112_v32  ;;  %v1119_v63 = vadd.f32 %v1117_v29, %v1088_v55 }
 0x203   :  { %v1120_v4 = vadd.f32 %v1117_v29, %v1101_v16 }
 0x204   :  { %v1121_v7 = vadd.f32 %v1117_v29, %v1114_v30 }
 0x205   :  { %v1125_v57 = vrot.slane %v1120_v4, 7 }
 0x206   :  { %v1126_v33 = vrot.slane %v1121_v7, 6 }
 0x207   :  { %v1128_v38 = vsel %vm1127_vm4, %v1119_v63, %v1125_v57 }
 0x208   :  { %v1130_v28 = vsel %vm1129_vm5, %v1128_v38, %v1126_v33 }
 0x209   :  { %1136 = vst.msk [vmem:[#allocation2] sm:$0x7] %vm1134_vm6, %v1130_v28 }
 0x20a   :  { %1147 = dma.vmem_to_hbm [thread:$0]  %s1143_s5, 48, %s1145_s8, [#allocation3]  }
 0x20b   :  { %1296 = dma.done.wait [#allocation3], 48  }
 0x20c   :  { %1297 = vsyncadd [#allocation3], 4294967248 }
 0x20d   :  { %1152 = vsyncpa [#allocation3], 1 }

</bundles_post_ra>
